<compile_context>
chip_gen: v7x
topology: tpu7x:2x2x1
jax: 0.10.0
libtpu: 0.0.40
codegen_flags: <defaults>
</compile_context>

<pallas_src>
import functools
import numpy as np
import jax
import jax.numpy as jnp
from jax.experimental import pallas as pl
from jax.experimental.pallas import tpu as pltpu

BN_EPS = 1e-5      # PyTorch nn.BatchNorm2d default (eval mode, running stats folded)
CH_ALIGN = 16      # sublane alignment for bf16-packed activations/weights
LANE = 128


def _round_up(x, m):
    return ((x + m - 1) // m) * m


def _fold_bn(p):
    scale = p["gamma"] / jnp.sqrt(p["var"] + BN_EPS)
    bias = p["beta"] - p["mean"] * scale
    return scale, bias


# --------------------------------------------------------------------------- #
# Fused C2f kernel.  In-kernel activation layout: channels on sublanes, the
# flattened zero-haloed (H+2)x(W+2) grid on lanes (window of Lw lanes, 128-mult).
# Branch scratch layout: slot i occupies sublanes [i*cp, (i+1)*cp) and lanes
# [G, G+Lw), with G zero guard lanes on each side for the shifted tap reads.
# --------------------------------------------------------------------------- #

def _make_c2f_kernel(n, cp, H, W, G, Lw, shortcut):
    Wp = W + 2
    CB = (2 + n) * cp

    def silu(y):  # y * sigmoid(y), reciprocal on the EUP slot
        return y * pl.reciprocal(1.0 + jnp.exp(-y), approx=True)

    def kernel(*refs):
        x_ref, mask_ref, wcv1_ref, scv1_ref, bcv1_ref = refs[:5]
        bparams = refs[5:5 + 6 * n]
        wcv2_ref, scv2_ref, bcv2_ref = refs[5 + 6 * n:8 + 6 * n]
        o_ref = refs[8 + 6 * n]
        br_ref = refs[9 + 6 * n]     # ((2+n)*cp, Lw + 2G) bf16 branch scratch
        col_ref = refs[10 + 6 * n]   # (9*cp, Lw) bf16 K-stacked im2col scratch

        m = mask_ref[...]            # (1, Lw) f32: 1 on interior pixels, 0 on halo/pad

        # Zero the guard lanes (scratch persists across grid steps / cores).
        br_ref[:, 0:G] = jnp.zeros((CB, G), br_ref.dtype)
        br_ref[:, G + Lw:G + Lw + G] = jnp.zeros((CB, G), br_ref.dtype)

        # ---- cv1 (1x1): both chunks in ONE matmul, written to branch slots 0,1 ----
        y = jnp.dot(wcv1_ref[...], x_ref[0], preferred_element_type=jnp.float32)
        y = y * scv1_ref[...] + bcv1_ref[...]
        y = silu(y) * m
        br_ref[0:2 * cp, G:G + Lw] = y.astype(br_ref.dtype)

        # ---- n fused Bottlenecks (3x3 -> 3x3 [+ residual]), all VMEM-resident ----
        def im2col(slot):
            # 9 lane-shifted views of the branch slot -> K-stacked (9*cp, Lw) scratch.
            for t in range(9):
                kh, kw = t // 3, t % 3
                s = G + (kh - 1) * Wp + (kw - 1)
                col_ref[t * cp:(t + 1) * cp, :] = br_ref[slot:slot + cp, s:s + Lw]

        for i in range(n):
            w1, s1, b1, w2, s2, b2 = bparams[6 * i:6 * i + 6]
            src = (1 + i) * cp       # input branch slot
            dst = (2 + i) * cp       # output branch slot

            im2col(src)
            h = jnp.dot(w1[...], col_ref[...], preferred_element_type=jnp.float32)
            h = silu(h * s1[...] + b1[...]) * m
            br_ref[dst:dst + cp, G:G + Lw] = h.astype(br_ref.dtype)  # aligned store

            im2col(dst)              # read the intermediate back with zero halos
            y2 = jnp.dot(w2[...], col_ref[...], preferred_element_type=jnp.float32)
            y2 = silu(y2 * s2[...] + b2[...]) * m
            if shortcut:
                y2 = y2 + br_ref[src:src + cp, G:G + Lw].astype(jnp.float32)
            br_ref[dst:dst + cp, G:G + Lw] = y2.astype(br_ref.dtype)

        # ---- cv2 (1x1) over the fused channel concat: one K=(2+n)*cp matmul ----
        z = jnp.dot(wcv2_ref[...], br_ref[:, G:G + Lw],
                    preferred_element_type=jnp.float32)
        z = z * scv2_ref[...] + bcv2_ref[...]
        o_ref[0] = silu(z).astype(o_ref.dtype)       # dense, aligned full-block store

    return kernel


# ------------------------------ weight folding ------------------------------ #

def _prep_cv1(p, c, cp, c1p):
    """cv1 (1x1): both output chunks packed into one (2*cp, c1p) weight so one matmul
    writes both branch slots."""
    w = p["w"].reshape(p["w"].shape[0], -1)            # (2c, C1)
    C1 = w.shape[1]
    scale, bias = _fold_bn(p)
    wpk = jnp.zeros((2 * cp, c1p), jnp.float32)
    wpk = wpk.at[0:c, 0:C1].set(w[0:c]).at[cp:cp + c, 0:C1].set(w[c:2 * c])
    s = jnp.zeros((2 * cp, 1), jnp.float32)
    s = s.at[0:c, 0].set(scale[0:c]).at[cp:cp + c, 0].set(scale[c:2 * c])
    b = jnp.zeros((2 * cp, 1), jnp.float32)
    b = b.at[0:c, 0].set(bias[0:c]).at[cp:cp + c, 0].set(bias[c:2 * c])
    return wpk.astype(jnp.bfloat16), s, b


def _prep_3x3(p, cp):
    """3x3 conv weight as (cp, 9*cp) for the K-stacked im2col matmul (tap t = kh*3+kw)."""
    w = p["w"]                                         # (cout, cin, 3, 3)
    cout, cin = w.shape[0], w.shape[1]
    scale, bias = _fold_bn(p)
    w9 = jnp.transpose(w, (0, 2, 3, 1)).reshape(cout, 9, cin)
    w9 = jnp.pad(w9, ((0, cp - cout), (0, 0), (0, cp - cin))).reshape(cp, 9 * cp)
    s = jnp.pad(scale, (0, cp - cout)).reshape(cp, 1)
    b = jnp.pad(bias, (0, cp - cout)).reshape(cp, 1)
    return w9.astype(jnp.bfloat16), s, b


def _prep_cv2(p, n_in, c, cp, c2, c2p):
    """cv2 (1x1) weight laid out against the branch-scratch channel layout
    (chunk i at columns [i*cp, i*cp + c))."""
    w = p["w"].reshape(c2, n_in * c)
    scale, bias = _fold_bn(p)
    wpk = jnp.zeros((c2p, n_in * cp), jnp.float32)
    for i in range(n_in):
        wpk = wpk.at[0:c2, i * cp:i * cp + c].set(w[:, i * c:(i + 1) * c])
    s = jnp.pad(scale, (0, c2p - c2)).reshape(c2p, 1)
    b = jnp.pad(bias, (0, c2p - c2)).reshape(c2p, 1)
    return wpk.astype(jnp.bfloat16), s, b


def _interior_mask(H, W, Lw):
    Wp = W + 2
    f = np.arange(Lw)
    hh, ww = f // Wp, f % Wp
    m = (f < (H + 2) * Wp) & (hh >= 1) & (hh <= H) & (ww >= 1) & (ww <= W)
    return jnp.asarray(m.astype(np.float32).reshape(1, Lw))


# ------------------------------ forward (Pallas) ----------------------------- #

def c2f_forward_pallas(x_nchw, params, *, shortcut):
    """C2f forward (eval-mode BN folded), NCHW f32 in -> NCHW f32 out."""
    N, C1, H, W = x_nchw.shape
    n = len(params["m"])                               # static
    c = params["cv1"]["w"].shape[0] // 2               # hidden channels (static)
    c2 = params["cv2"]["w"].shape[0]

    Wp = W + 2
    Limg = (H + 2) * Wp
    Lw = _round_up(Limg, LANE)                         # compute window (lane-aligned)
    G = _round_up(Wp + 1, LANE)                        # halo guard for shifted reads
    c1p = _round_up(C1, CH_ALIGN)
    cp = _round_up(c, CH_ALIGN)
    c2p = _round_up(c2, CH_ALIGN)
    CB = (2 + n) * cp

    mask = _interior_mask(H, W, Lw)

    # NCHW -> padded-flat bf16 (N, c1p, Lw): zero 1-px halo + flatten; the only
    # host-side layout conversion (no NCHW<->NHWC transpose anywhere).
    xp = jnp.pad(x_nchw, ((0, 0), (0, c1p - C1), (1, 1), (1, 1)))
    xp = jnp.pad(xp.reshape(N, c1p, Limg), ((0, 0), (0, 0), (0, Lw - Limg)))
    xp = xp.astype(jnp.bfloat16)

    wcv1, scv1, bcv1 = _prep_cv1(params["cv1"], c, cp, c1p)
    bparams = []
    for mp in params["m"]:
        bparams += list(_prep_3x3(mp["cv1"], cp)) + list(_prep_3x3(mp["cv2"], cp))
    wcv2, scv2, bcv2 = _prep_cv2(params["cv2"], 2 + n, c, cp, c2, c2p)

    def act_spec(ch):
        return pl.BlockSpec((1, ch, Lw), lambda b: (b, 0, 0))

    def rep_spec(a):  # replicated (weights / scale / bias / mask): same block every step
        return pl.BlockSpec(a.shape, lambda b: (0,) * a.ndim)

    ins = [xp, mask, wcv1, scv1, bcv1, *bparams, wcv2, scv2, bcv2]
    in_specs = [act_spec(c1p), rep_spec(mask),
                rep_spec(wcv1), rep_spec(scv1), rep_spec(bcv1)]
    in_specs += [rep_spec(a) for a in bparams]
    in_specs += [rep_spec(wcv2), rep_spec(scv2), rep_spec(bcv2)]

    out = pl.pallas_call(
        _make_c2f_kernel(n, cp, H, W, G, Lw, shortcut),
        out_shape=jax.ShapeDtypeStruct((N, c2p, Lw), jnp.float32),
        grid=(N,),
        in_specs=in_specs,
        out_specs=act_spec(c2p),
        scratch_shapes=[pltpu.VMEM((CB, Lw + 2 * G), jnp.bfloat16),   # branch buffer
                        pltpu.VMEM((9 * cp, Lw), jnp.bfloat16)],      # im2col buffer
        compiler_params=pltpu.CompilerParams(
            dimension_semantics=("parallel",),        # batch shards across TCs (v7x)
            vmem_limit_bytes=48 * 1024 * 1024),       # > v5e/v6e scoped default, < v7x 64MiB
    )(*ins)

    # padded-flat -> NCHW (drop halo, channel padding, lane padding)
    out = out[:, :c2, :Limg].reshape(N, c2, H + 2, Wp)[:, :, 1:H + 1, 1:W + 1]
    return out


# -------------------------- deterministic parameters ------------------------- #

def init_conv_params(key, c_in, c_out, k):
    kw, kb, kg, km, kv = jax.random.split(key, 5)
    w = jax.random.normal(kw, (c_out, c_in, k, k), jnp.float32) / np.sqrt(c_in * k * k)
    gamma = 1.0 + 0.1 * jax.random.normal(kg, (c_out,), jnp.float32)
    beta = 0.1 * jax.random.normal(kb, (c_out,), jnp.float32)
    mean = 0.1 * jax.random.normal(km, (c_out,), jnp.float32)
    var = jax.random.uniform(kv, (c_out,), jnp.float32, minval=0.5, maxval=1.5)
    return dict(w=w, gamma=gamma, beta=beta, mean=mean, var=var)


def init_c2f_params(key, c1, c2, n, e=0.5):
    c = int(c2 * e)
    keys = jax.random.split(key, 2 + 2 * n)
    return dict(
        cv1=init_conv_params(keys[0], c1, 2 * c, 1),
        cv2=init_conv_params(keys[1], (2 + n) * c, c2, 1),
        m=[dict(cv1=init_conv_params(keys[2 + 2 * i], c, c, 3),
                cv2=init_conv_params(keys[3 + 2 * i], c, c, 3)) for i in range(n)],
    )


# ----------------------------- pure-JAX reference ---------------------------- #

def _conv_bn_silu_ref(x_nchw, p, pad):
    y = jax.lax.conv_general_dilated(
        x_nchw, p["w"], window_strides=(1, 1),
        padding=[(pad, pad), (pad, pad)],
        dimension_numbers=("NCHW", "OIHW", "NCHW"),
        precision=jax.lax.Precision.HIGHEST)
    scale, bias = _fold_bn(p)
    y = y * scale[None, :, None, None] + bias[None, :, None, None]
    return y * jax.nn.sigmoid(y)


def c2f_forward_ref(x_nchw, params, shortcut):
    c = params["cv1"]["w"].shape[0] // 2
    y = _conv_bn_silu_ref(x_nchw, params["cv1"], 0)
    ys = [y[:, :c], y[:, c:]]
    for mp in params["m"]:
        cur = ys[-1]
        h = _conv_bn_silu_ref(cur, mp["cv1"], 1)
        out = _conv_bn_silu_ref(h, mp["cv2"], 1)
        if shortcut:
            out = cur + out
        ys.append(out)
    return _conv_bn_silu_ref(jnp.concatenate(ys, axis=1), params["cv2"], 0)


# ----------------------------------- main ------------------------------------ #

if __name__ == "__main__":
    key = jax.random.PRNGKey(0)

    def run_case(case_key, B, C1, C2, H, W, n, shortcut):
        kx, kp = jax.random.split(case_key)
        x = jax.random.normal(kx, (B, C1, H, W), jnp.float32)
        params = init_c2f_params(kp, C1, C2, n)
        fwd = jax.jit(functools.partial(c2f_forward_pallas, shortcut=shortcut))
        out = jax.block_until_ready(fwd(x, params))
        ref = c2f_forward_ref(x, params, shortcut)
        assert out.shape == (B, C2, H, W), out.shape
        out_np, ref_np = np.asarray(out), np.asarray(ref)
        max_err = float(np.max(np.abs(out_np - ref_np)))
        mean_err = float(np.mean(np.abs(out_np - ref_np)))
        # bf16 MXU operands (f32 accumulation) => loosened tolerance vs the f32 reference.
        assert np.allclose(out_np, ref_np, atol=1e-1, rtol=1e-1), \
            f"max_err={max_err} mean_err={mean_err}"
        assert mean_err < 2e-2, f"mean_err={mean_err}"

    k1, k2 = jax.random.split(key)
    # C2f(c1=4, c2=4, n=1, shortcut=False) -- matches the original test configuration.
    run_case(k1, B=2, C1=4, C2=4, H=16, W=16, n=1, shortcut=False)
    # Also exercise the fused residual path and the multi-branch cv2 concat fusion.
    run_case(k2, B=2, C1=4, C2=4, H=16, W=16, n=2, shortcut=True)
    print("KERNEL_OK")
</pallas_src>

<mosaic_0001>
module attributes {stable_mosaic.version = 11 : i64} {
  func.func @kernel(%arg0: i32, %arg1: memref<1x16x384xbf16, #tpu.memory_space<vmem>>, %arg2: memref<1x384xf32, #tpu.memory_space<vmem>>, %arg3: memref<32x16xbf16, #tpu.memory_space<vmem>>, %arg4: memref<32x1xf32, #tpu.memory_space<vmem>>, %arg5: memref<32x1xf32, #tpu.memory_space<vmem>>, %arg6: memref<16x144xbf16, #tpu.memory_space<vmem>>, %arg7: memref<16x1xf32, #tpu.memory_space<vmem>>, %arg8: memref<16x1xf32, #tpu.memory_space<vmem>>, %arg9: memref<16x144xbf16, #tpu.memory_space<vmem>>, %arg10: memref<16x1xf32, #tpu.memory_space<vmem>>, %arg11: memref<16x1xf32, #tpu.memory_space<vmem>>, %arg12: memref<16x48xbf16, #tpu.memory_space<vmem>>, %arg13: memref<16x1xf32, #tpu.memory_space<vmem>>, %arg14: memref<16x1xf32, #tpu.memory_space<vmem>>, %arg15: memref<1x16x384xf32, #tpu.memory_space<vmem>>, %arg16: memref<48x640xbf16, #tpu.memory_space<vmem>>, %arg17: memref<144x384xbf16, #tpu.memory_space<vmem>>) attributes {dimension_semantics = [#tpu.dimension_semantics<parallel>], iteration_bounds = array<i64: 2>, scalar_prefetch = 0 : i64, scratch_operands = 2 : i64, tpu.core_type = #tpu.core_type<tc>, window_params = [{transform_indices = @transform_0, window_bounds = array<i64: 1, 16, 384>}, {pipeline_mode = #tpu.pipeline_mode<synchronous>, transform_indices = @transform_1, window_bounds = array<i64: 1, 384>}, {pipeline_mode = #tpu.pipeline_mode<synchronous>, transform_indices = @transform_2, window_bounds = array<i64: 32, 16>}, {pipeline_mode = #tpu.pipeline_mode<synchronous>, transform_indices = @transform_3, window_bounds = array<i64: 32, 1>}, {pipeline_mode = #tpu.pipeline_mode<synchronous>, transform_indices = @transform_4, window_bounds = array<i64: 32, 1>}, {pipeline_mode = #tpu.pipeline_mode<synchronous>, transform_indices = @transform_5, window_bounds = array<i64: 16, 144>}, {pipeline_mode = #tpu.pipeline_mode<synchronous>, transform_indices = @transform_6, window_bounds = array<i64: 16, 1>}, {pipeline_mode = #tpu.pipeline_mode<synchronous>, transform_indices = @transform_7, window_bounds = array<i64: 16, 1>}, {pipeline_mode = #tpu.pipeline_mode<synchronous>, transform_indices = @transform_8, window_bounds = array<i64: 16, 144>}, {pipeline_mode = #tpu.pipeline_mode<synchronous>, transform_indices = @transform_9, window_bounds = array<i64: 16, 1>}, {pipeline_mode = #tpu.pipeline_mode<synchronous>, transform_indices = @transform_10, window_bounds = array<i64: 16, 1>}, {pipeline_mode = #tpu.pipeline_mode<synchronous>, transform_indices = @transform_11, window_bounds = array<i64: 16, 48>}, {pipeline_mode = #tpu.pipeline_mode<synchronous>, transform_indices = @transform_12, window_bounds = array<i64: 16, 1>}, {pipeline_mode = #tpu.pipeline_mode<synchronous>, transform_indices = @transform_13, window_bounds = array<i64: 16, 1>}, {transform_indices = @transform_14, window_bounds = array<i64: 1, 16, 384>}]} {
    %c0 = arith.constant 0 : index
    %c0_0 = arith.constant 0 : index
    %0 = vector.load %arg2[%c0, %c0_0] : memref<1x384xf32, #tpu.memory_space<vmem>>, vector<1x384xf32>
    %cst = arith.constant 0.000000e+00 : bf16
    %1 = vector.broadcast %cst : bf16 to vector<48x128xbf16>
    %c0_1 = arith.constant 0 : index
    %c0_2 = arith.constant 0 : index
    %2 = vector.load %arg16[%c0_1, %c0_2] : memref<48x640xbf16, #tpu.memory_space<vmem>>, vector<48x128xbf16>
    tpu.vector_store %arg16[%c0_1, %c0_2], %1 {strides = array<i32>} : memref<48x640xbf16, #tpu.memory_space<vmem>>, vector<48x128xbf16>,
    %cst_3 = arith.constant 0.000000e+00 : bf16
    %3 = vector.broadcast %cst_3 : bf16 to vector<48x128xbf16>
    %c0_4 = arith.constant 0 : index
    %c512 = arith.constant 512 : index
    %4 = vector.load %arg16[%c0_4, %c512] : memref<48x640xbf16, #tpu.memory_space<vmem>>, vector<48x128xbf16>
    tpu.vector_store %arg16[%c0_4, %c512], %3 {strides = array<i32>} : memref<48x640xbf16, #tpu.memory_space<vmem>>, vector<48x128xbf16>,
    %c0_5 = arith.constant 0 : index
    %c0_6 = arith.constant 0 : index
    %5 = vector.load %arg3[%c0_5, %c0_6] : memref<32x16xbf16, #tpu.memory_space<vmem>>, vector<32x16xbf16>
    %c0_7 = arith.constant 0 : index
    %c0_8 = arith.constant 0 : index
    %c0_9 = arith.constant 0 : index
    %6 = vector.load %arg1[%c0_7, %c0_8, %c0_9] : memref<1x16x384xbf16, #tpu.memory_space<vmem>>, vector<1x16x384xbf16>
    %7 = vector.shape_cast %6 : vector<1x16x384xbf16> to vector<16x384xbf16>
    %cst_10 = arith.constant dense<0.000000e+00> : vector<32x384xf32>
    %8 = tpu.matmul %5, %7, %cst_10 {dimension_numbers = #tpu.dot_dimension_numbers<[1], [0], [0], [1], [0, 0, 1, 1], [], []>} : vector<32x16xbf16>, vector<16x384xbf16>, vector<32x384xf32> -> vector<32x384xf32>
    %c0_11 = arith.constant 0 : index
    %c0_12 = arith.constant 0 : index
    %9 = vector.load %arg4[%c0_11, %c0_12] : memref<32x1xf32, #tpu.memory_space<vmem>>, vector<32x1xf32>
    %10 = vector.broadcast %9 : vector<32x1xf32> to vector<32x384xf32>
    %11 = arith.mulf %8, %10 : vector<32x384xf32>
    %c0_13 = arith.constant 0 : index
    %c0_14 = arith.constant 0 : index
    %12 = vector.load %arg5[%c0_13, %c0_14] : memref<32x1xf32, #tpu.memory_space<vmem>>, vector<32x1xf32>
    %13 = vector.broadcast %12 : vector<32x1xf32> to vector<32x384xf32>
    %14 = arith.addf %11, %13 : vector<32x384xf32>
    %cst_15 = arith.constant 0.000000e+00 : f32
    %15 = vector.broadcast %cst_15 : f32 to vector<32x384xf32>
    %16 = arith.subf %15, %14 : vector<32x384xf32>
    %17 = math.exp %16 : vector<32x384xf32>
    %cst_16 = arith.constant 1.000000e+00 : f32
    %18 = vector.broadcast %cst_16 : f32 to vector<32x384xf32>
    %19 = arith.addf %18, %17 : vector<32x384xf32>
    %20 = tpu.reciprocal %19 {approx = true} : vector<32x384xf32> -> vector<32x384xf32>
    %21 = arith.mulf %14, %20 : vector<32x384xf32>
    %22 = vector.broadcast %0 : vector<1x384xf32> to vector<32x384xf32>
    %23 = arith.mulf %21, %22 : vector<32x384xf32>
    %24 = arith.truncf %23 : vector<32x384xf32> to vector<32x384xbf16>
    %c0_17 = arith.constant 0 : index
    %c128 = arith.constant 128 : index
    %25 = vector.load %arg16[%c0_17, %c128] : memref<48x640xbf16, #tpu.memory_space<vmem>>, vector<32x384xbf16>
    tpu.vector_store %arg16[%c0_17, %c128], %24 {strides = array<i32>} : memref<48x640xbf16, #tpu.memory_space<vmem>>, vector<32x384xbf16>,
    %c16 = arith.constant 16 : index
    %c109 = arith.constant 109 : index
    %26 = vector.load %arg16[%c16, %c109] : memref<48x640xbf16, #tpu.memory_space<vmem>>, vector<16x384xbf16>
    %c0_18 = arith.constant 0 : index
    %c0_19 = arith.constant 0 : index
    %27 = vector.load %arg17[%c0_18, %c0_19] : memref<144x384xbf16, #tpu.memory_space<vmem>>, vector<16x384xbf16>
    tpu.vector_store %arg17[%c0_18, %c0_19], %26 {strides = array<i32>} : memref<144x384xbf16, #tpu.memory_space<vmem>>, vector<16x384xbf16>,
    %c16_20 = arith.constant 16 : index
    %c110 = arith.constant 110 : index
    %28 = vector.load %arg16[%c16_20, %c110] : memref<48x640xbf16, #tpu.memory_space<vmem>>, vector<16x384xbf16>
    %c16_21 = arith.constant 16 : index
    %c0_22 = arith.constant 0 : index
    %29 = vector.load %arg17[%c16_21, %c0_22] : memref<144x384xbf16, #tpu.memory_space<vmem>>, vector<16x384xbf16>
    tpu.vector_store %arg17[%c16_21, %c0_22], %28 {strides = array<i32>} : memref<144x384xbf16, #tpu.memory_space<vmem>>, vector<16x384xbf16>,
    %c16_23 = arith.constant 16 : index
    %c111 = arith.constant 111 : index
    %30 = vector.load %arg16[%c16_23, %c111] : memref<48x640xbf16, #tpu.memory_space<vmem>>, vector<16x384xbf16>
    %c32 = arith.constant 32 : index
    %c0_24 = arith.constant 0 : index
    %31 = vector.load %arg17[%c32, %c0_24] : memref<144x384xbf16, #tpu.memory_space<vmem>>, vector<16x384xbf16>
    tpu.vector_store %arg17[%c32, %c0_24], %30 {strides = array<i32>} : memref<144x384xbf16, #tpu.memory_space<vmem>>, vector<16x384xbf16>,
    %c16_25 = arith.constant 16 : index
    %c127 = arith.constant 127 : index
    %32 = vector.load %arg16[%c16_25, %c127] : memref<48x640xbf16, #tpu.memory_space<vmem>>, vector<16x384xbf16>
    %c48 = arith.constant 48 : index
    %c0_26 = arith.constant 0 : index
    %33 = vector.load %arg17[%c48, %c0_26] : memref<144x384xbf16, #tpu.memory_space<vmem>>, vector<16x384xbf16>
    tpu.vector_store %arg17[%c48, %c0_26], %32 {strides = array<i32>} : memref<144x384xbf16, #tpu.memory_space<vmem>>, vector<16x384xbf16>,
    %c16_27 = arith.constant 16 : index
    %c128_28 = arith.constant 128 : index
    %34 = vector.load %arg16[%c16_27, %c128_28] : memref<48x640xbf16, #tpu.memory_space<vmem>>, vector<16x384xbf16>
    %c64 = arith.constant 64 : index
    %c0_29 = arith.constant 0 : index
    %35 = vector.load %arg17[%c64, %c0_29] : memref<144x384xbf16, #tpu.memory_space<vmem>>, vector<16x384xbf16>
    tpu.vector_store %arg17[%c64, %c0_29], %34 {strides = array<i32>} : memref<144x384xbf16, #tpu.memory_space<vmem>>, vector<16x384xbf16>,
    %c16_30 = arith.constant 16 : index
    %c129 = arith.constant 129 : index
    %36 = vector.load %arg16[%c16_30, %c129] : memref<48x640xbf16, #tpu.memory_space<vmem>>, vector<16x384xbf16>
    %c80 = arith.constant 80 : index
    %c0_31 = arith.constant 0 : index
    %37 = vector.load %arg17[%c80, %c0_31] : memref<144x384xbf16, #tpu.memory_space<vmem>>, vector<16x384xbf16>
    tpu.vector_store %arg17[%c80, %c0_31], %36 {strides = array<i32>} : memref<144x384xbf16, #tpu.memory_space<vmem>>, vector<16x384xbf16>,
    %c16_32 = arith.constant 16 : index
    %c145 = arith.constant 145 : index
    %38 = vector.load %arg16[%c16_32, %c145] : memref<48x640xbf16, #tpu.memory_space<vmem>>, vector<16x384xbf16>
    %c96 = arith.constant 96 : index
    %c0_33 = arith.constant 0 : index
    %39 = vector.load %arg17[%c96, %c0_33] : memref<144x384xbf16, #tpu.memory_space<vmem>>, vector<16x384xbf16>
    tpu.vector_store %arg17[%c96, %c0_33], %38 {strides = array<i32>} : memref<144x384xbf16, #tpu.memory_space<vmem>>, vector<16x384xbf16>,
    %c16_34 = arith.constant 16 : index
    %c146 = arith.constant 146 : index
    %40 = vector.load %arg16[%c16_34, %c146] : memref<48x640xbf16, #tpu.memory_space<vmem>>, vector<16x384xbf16>
    %c112 = arith.constant 112 : index
    %c0_35 = arith.constant 0 : index
    %41 = vector.load %arg17[%c112, %c0_35] : memref<144x384xbf16, #tpu.memory_space<vmem>>, vector<16x384xbf16>
    tpu.vector_store %arg17[%c112, %c0_35], %40 {strides = array<i32>} : memref<144x384xbf16, #tpu.memory_space<vmem>>, vector<16x384xbf16>,
    %c16_36 = arith.constant 16 : index
    %c147 = arith.constant 147 : index
    %42 = vector.load %arg16[%c16_36, %c147] : memref<48x640xbf16, #tpu.memory_space<vmem>>, vector<16x384xbf16>
    %c128_37 = arith.constant 128 : index
    %c0_38 = arith.constant 0 : index
    %43 = vector.load %arg17[%c128_37, %c0_38] : memref<144x384xbf16, #tpu.memory_space<vmem>>, vector<16x384xbf16>
    tpu.vector_store %arg17[%c128_37, %c0_38], %42 {strides = array<i32>} : memref<144x384xbf16, #tpu.memory_space<vmem>>, vector<16x384xbf16>,
    %c0_39 = arith.constant 0 : index
    %c0_40 = arith.constant 0 : index
    %44 = vector.load %arg6[%c0_39, %c0_40] : memref<16x144xbf16, #tpu.memory_space<vmem>>, vector<16x144xbf16>
    %c0_41 = arith.constant 0 : index
    %c0_42 = arith.constant 0 : index
    %45 = vector.load %arg17[%c0_41, %c0_42] : memref<144x384xbf16, #tpu.memory_space<vmem>>, vector<144x384xbf16>
    %cst_43 = arith.constant dense<0.000000e+00> : vector<16x384xf32>
    %46 = tpu.matmul %44, %45, %cst_43 {dimension_numbers = #tpu.dot_dimension_numbers<[1], [0], [0], [1], [0, 0, 1, 1], [], []>} : vector<16x144xbf16>, vector<144x384xbf16>, vector<16x384xf32> -> vector<16x384xf32>
    %c0_44 = arith.constant 0 : index
    %c0_45 = arith.constant 0 : index
    %47 = vector.load %arg7[%c0_44, %c0_45] : memref<16x1xf32, #tpu.memory_space<vmem>>, vector<16x1xf32>
    %48 = vector.broadcast %47 : vector<16x1xf32> to vector<16x384xf32>
    %49 = arith.mulf %46, %48 : vector<16x384xf32>
    %c0_46 = arith.constant 0 : index
    %c0_47 = arith.constant 0 : index
    %50 = vector.load %arg8[%c0_46, %c0_47] : memref<16x1xf32, #tpu.memory_space<vmem>>, vector<16x1xf32>
    %51 = vector.broadcast %50 : vector<16x1xf32> to vector<16x384xf32>
    %52 = arith.addf %49, %51 : vector<16x384xf32>
    %cst_48 = arith.constant 0.000000e+00 : f32
    %53 = vector.broadcast %cst_48 : f32 to vector<16x384xf32>
    %54 = arith.subf %53, %52 : vector<16x384xf32>
    %55 = math.exp %54 : vector<16x384xf32>
    %cst_49 = arith.constant 1.000000e+00 : f32
    %56 = vector.broadcast %cst_49 : f32 to vector<16x384xf32>
    %57 = arith.addf %56, %55 : vector<16x384xf32>
    %58 = tpu.reciprocal %57 {approx = true} : vector<16x384xf32> -> vector<16x384xf32>
    %59 = arith.mulf %52, %58 : vector<16x384xf32>
    %60 = vector.broadcast %0 : vector<1x384xf32> to vector<16x384xf32>
    %61 = arith.mulf %59, %60 : vector<16x384xf32>
    %62 = arith.truncf %61 : vector<16x384xf32> to vector<16x384xbf16>
    %c32_50 = arith.constant 32 : index
    %c128_51 = arith.constant 128 : index
    %63 = vector.load %arg16[%c32_50, %c128_51] : memref<48x640xbf16, #tpu.memory_space<vmem>>, vector<16x384xbf16>
    tpu.vector_store %arg16[%c32_50, %c128_51], %62 {strides = array<i32>} : memref<48x640xbf16, #tpu.memory_space<vmem>>, vector<16x384xbf16>,
    %c32_52 = arith.constant 32 : index
    %c109_53 = arith.constant 109 : index
    %64 = vector.load %arg16[%c32_52, %c109_53] : memref<48x640xbf16, #tpu.memory_space<vmem>>, vector<16x384xbf16>
    %c0_54 = arith.constant 0 : index
    %c0_55 = arith.constant 0 : index
    %65 = vector.load %arg17[%c0_54, %c0_55] : memref<144x384xbf16, #tpu.memory_space<vmem>>, vector<16x384xbf16>
    tpu.vector_store %arg17[%c0_54, %c0_55], %64 {strides = array<i32>} : memref<144x384xbf16, #tpu.memory_space<vmem>>, vector<16x384xbf16>,
    %c32_56 = arith.constant 32 : index
    %c110_57 = arith.constant 110 : index
    %66 = vector.load %arg16[%c32_56, %c110_57] : memref<48x640xbf16, #tpu.memory_space<vmem>>, vector<16x384xbf16>
    %c16_58 = arith.constant 16 : index
    %c0_59 = arith.constant 0 : index
    %67 = vector.load %arg17[%c16_58, %c0_59] : memref<144x384xbf16, #tpu.memory_space<vmem>>, vector<16x384xbf16>
    tpu.vector_store %arg17[%c16_58, %c0_59], %66 {strides = array<i32>} : memref<144x384xbf16, #tpu.memory_space<vmem>>, vector<16x384xbf16>,
    %c32_60 = arith.constant 32 : index
    %c111_61 = arith.constant 111 : index
    %68 = vector.load %arg16[%c32_60, %c111_61] : memref<48x640xbf16, #tpu.memory_space<vmem>>, vector<16x384xbf16>
    %c32_62 = arith.constant 32 : index
    %c0_63 = arith.constant 0 : index
    %69 = vector.load %arg17[%c32_62, %c0_63] : memref<144x384xbf16, #tpu.memory_space<vmem>>, vector<16x384xbf16>
    tpu.vector_store %arg17[%c32_62, %c0_63], %68 {strides = array<i32>} : memref<144x384xbf16, #tpu.memory_space<vmem>>, vector<16x384xbf16>,
    %c32_64 = arith.constant 32 : index
    %c127_65 = arith.constant 127 : index
    %70 = vector.load %arg16[%c32_64, %c127_65] : memref<48x640xbf16, #tpu.memory_space<vmem>>, vector<16x384xbf16>
    %c48_66 = arith.constant 48 : index
    %c0_67 = arith.constant 0 : index
    %71 = vector.load %arg17[%c48_66, %c0_67] : memref<144x384xbf16, #tpu.memory_space<vmem>>, vector<16x384xbf16>
    tpu.vector_store %arg17[%c48_66, %c0_67], %70 {strides = array<i32>} : memref<144x384xbf16, #tpu.memory_space<vmem>>, vector<16x384xbf16>,
    %c32_68 = arith.constant 32 : index
    %c128_69 = arith.constant 128 : index
    %72 = vector.load %arg16[%c32_68, %c128_69] : memref<48x640xbf16, #tpu.memory_space<vmem>>, vector<16x384xbf16>
    %c64_70 = arith.constant 64 : index
    %c0_71 = arith.constant 0 : index
    %73 = vector.load %arg17[%c64_70, %c0_71] : memref<144x384xbf16, #tpu.memory_space<vmem>>, vector<16x384xbf16>
    tpu.vector_store %arg17[%c64_70, %c0_71], %72 {strides = array<i32>} : memref<144x384xbf16, #tpu.memory_space<vmem>>, vector<16x384xbf16>,
    %c32_72 = arith.constant 32 : index
    %c129_73 = arith.constant 129 : index
    %74 = vector.load %arg16[%c32_72, %c129_73] : memref<48x640xbf16, #tpu.memory_space<vmem>>, vector<16x384xbf16>
    %c80_74 = arith.constant 80 : index
    %c0_75 = arith.constant 0 : index
    %75 = vector.load %arg17[%c80_74, %c0_75] : memref<144x384xbf16, #tpu.memory_space<vmem>>, vector<16x384xbf16>
    tpu.vector_store %arg17[%c80_74, %c0_75], %74 {strides = array<i32>} : memref<144x384xbf16, #tpu.memory_space<vmem>>, vector<16x384xbf16>,
    %c32_76 = arith.constant 32 : index
    %c145_77 = arith.constant 145 : index
    %76 = vector.load %arg16[%c32_76, %c145_77] : memref<48x640xbf16, #tpu.memory_space<vmem>>, vector<16x384xbf16>
    %c96_78 = arith.constant 96 : index
    %c0_79 = arith.constant 0 : index
    %77 = vector.load %arg17[%c96_78, %c0_79] : memref<144x384xbf16, #tpu.memory_space<vmem>>, vector<16x384xbf16>
    tpu.vector_store %arg17[%c96_78, %c0_79], %76 {strides = array<i32>} : memref<144x384xbf16, #tpu.memory_space<vmem>>, vector<16x384xbf16>,
    %c32_80 = arith.constant 32 : index
    %c146_81 = arith.constant 146 : index
    %78 = vector.load %arg16[%c32_80, %c146_81] : memref<48x640xbf16, #tpu.memory_space<vmem>>, vector<16x384xbf16>
    %c112_82 = arith.constant 112 : index
    %c0_83 = arith.constant 0 : index
    %79 = vector.load %arg17[%c112_82, %c0_83] : memref<144x384xbf16, #tpu.memory_space<vmem>>, vector<16x384xbf16>
    tpu.vector_store %arg17[%c112_82, %c0_83], %78 {strides = array<i32>} : memref<144x384xbf16, #tpu.memory_space<vmem>>, vector<16x384xbf16>,
    %c32_84 = arith.constant 32 : index
    %c147_85 = arith.constant 147 : index
    %80 = vector.load %arg16[%c32_84, %c147_85] : memref<48x640xbf16, #tpu.memory_space<vmem>>, vector<16x384xbf16>
    %c128_86 = arith.constant 128 : index
    %c0_87 = arith.constant 0 : index
    %81 = vector.load %arg17[%c128_86, %c0_87] : memref<144x384xbf16, #tpu.memory_space<vmem>>, vector<16x384xbf16>
    tpu.vector_store %arg17[%c128_86, %c0_87], %80 {strides = array<i32>} : memref<144x384xbf16, #tpu.memory_space<vmem>>, vector<16x384xbf16>,
    %c0_88 = arith.constant 0 : index
    %c0_89 = arith.constant 0 : index
    %82 = vector.load %arg9[%c0_88, %c0_89] : memref<16x144xbf16, #tpu.memory_space<vmem>>, vector<16x144xbf16>
    %c0_90 = arith.constant 0 : index
    %c0_91 = arith.constant 0 : index
    %83 = vector.load %arg17[%c0_90, %c0_91] : memref<144x384xbf16, #tpu.memory_space<vmem>>, vector<144x384xbf16>
    %cst_92 = arith.constant dense<0.000000e+00> : vector<16x384xf32>
    %84 = tpu.matmul %82, %83, %cst_92 {dimension_numbers = #tpu.dot_dimension_numbers<[1], [0], [0], [1], [0, 0, 1, 1], [], []>} : vector<16x144xbf16>, vector<144x384xbf16>, vector<16x384xf32> -> vector<16x384xf32>
    %c0_93 = arith.constant 0 : index
    %c0_94 = arith.constant 0 : index
    %85 = vector.load %arg10[%c0_93, %c0_94] : memref<16x1xf32, #tpu.memory_space<vmem>>, vector<16x1xf32>
    %86 = vector.broadcast %85 : vector<16x1xf32> to vector<16x384xf32>
    %87 = arith.mulf %84, %86 : vector<16x384xf32>
    %c0_95 = arith.constant 0 : index
    %c0_96 = arith.constant 0 : index
    %88 = vector.load %arg11[%c0_95, %c0_96] : memref<16x1xf32, #tpu.memory_space<vmem>>, vector<16x1xf32>
    %89 = vector.broadcast %88 : vector<16x1xf32> to vector<16x384xf32>
    %90 = arith.addf %87, %89 : vector<16x384xf32>
    %cst_97 = arith.constant 0.000000e+00 : f32
    %91 = vector.broadcast %cst_97 : f32 to vector<16x384xf32>
    %92 = arith.subf %91, %90 : vector<16x384xf32>
    %93 = math.exp %92 : vector<16x384xf32>
    %cst_98 = arith.constant 1.000000e+00 : f32
    %94 = vector.broadcast %cst_98 : f32 to vector<16x384xf32>
    %95 = arith.addf %94, %93 : vector<16x384xf32>
    %96 = tpu.reciprocal %95 {approx = true} : vector<16x384xf32> -> vector<16x384xf32>
    %97 = arith.mulf %90, %96 : vector<16x384xf32>
    %98 = vector.broadcast %0 : vector<1x384xf32> to vector<16x384xf32>
    %99 = arith.mulf %97, %98 : vector<16x384xf32>
    %100 = arith.truncf %99 : vector<16x384xf32> to vector<16x384xbf16>
    %c32_99 = arith.constant 32 : index
    %c128_100 = arith.constant 128 : index
    %101 = vector.load %arg16[%c32_99, %c128_100] : memref<48x640xbf16, #tpu.memory_space<vmem>>, vector<16x384xbf16>
    tpu.vector_store %arg16[%c32_99, %c128_100], %100 {strides = array<i32>} : memref<48x640xbf16, #tpu.memory_space<vmem>>, vector<16x384xbf16>,
    %c0_101 = arith.constant 0 : index
    %c0_102 = arith.constant 0 : index
    %102 = vector.load %arg12[%c0_101, %c0_102] : memref<16x48xbf16, #tpu.memory_space<vmem>>, vector<16x48xbf16>
    %c0_103 = arith.constant 0 : index
    %c128_104 = arith.constant 128 : index
    %103 = vector.load %arg16[%c0_103, %c128_104] : memref<48x640xbf16, #tpu.memory_space<vmem>>, vector<48x384xbf16>
    %cst_105 = arith.constant dense<0.000000e+00> : vector<16x384xf32>
    %104 = tpu.matmul %102, %103, %cst_105 {dimension_numbers = #tpu.dot_dimension_numbers<[1], [0], [0], [1], [0, 0, 1, 1], [], []>} : vector<16x48xbf16>, vector<48x384xbf16>, vector<16x384xf32> -> vector<16x384xf32>
    %c0_106 = arith.constant 0 : index
    %c0_107 = arith.constant 0 : index
    %105 = vector.load %arg13[%c0_106, %c0_107] : memref<16x1xf32, #tpu.memory_space<vmem>>, vector<16x1xf32>
    %106 = vector.broadcast %105 : vector<16x1xf32> to vector<16x384xf32>
    %107 = arith.mulf %104, %106 : vector<16x384xf32>
    %c0_108 = arith.constant 0 : index
    %c0_109 = arith.constant 0 : index
    %108 = vector.load %arg14[%c0_108, %c0_109] : memref<16x1xf32, #tpu.memory_space<vmem>>, vector<16x1xf32>
    %109 = vector.broadcast %108 : vector<16x1xf32> to vector<16x384xf32>
    %110 = arith.addf %107, %109 : vector<16x384xf32>
    %cst_110 = arith.constant 0.000000e+00 : f32
    %111 = vector.broadcast %cst_110 : f32 to vector<16x384xf32>
    %112 = arith.subf %111, %110 : vector<16x384xf32>
    %113 = math.exp %112 : vector<16x384xf32>
    %cst_111 = arith.constant 1.000000e+00 : f32
    %114 = vector.broadcast %cst_111 : f32 to vector<16x384xf32>
    %115 = arith.addf %114, %113 : vector<16x384xf32>
    %116 = tpu.reciprocal %115 {approx = true} : vector<16x384xf32> -> vector<16x384xf32>
    %117 = arith.mulf %110, %116 : vector<16x384xf32>
    %c0_112 = arith.constant 0 : index
    %c0_113 = arith.constant 0 : index
    %c0_114 = arith.constant 0 : index
    %118 = vector.load %arg15[%c0_112, %c0_113, %c0_114] : memref<1x16x384xf32, #tpu.memory_space<vmem>>, vector<1x16x384xf32>
    %119 = vector.shape_cast %118 : vector<1x16x384xf32> to vector<16x384xf32>
    %120 = vector.shape_cast %117 : vector<16x384xf32> to vector<1x16x384xf32>
    tpu.vector_store %arg15[%c0_112, %c0_113, %c0_114], %120 {strides = array<i32>} : memref<1x16x384xf32, #tpu.memory_space<vmem>>, vector<1x16x384xf32>,
    return
  }
  func.func @transform_0(%arg0: i32) -> (i32, i32, i32) {
    %c0_i32 = arith.constant 0 : i32
    %c0_i32_0 = arith.constant 0 : i32
    %c0_i32_1 = arith.constant 0 : i32
    return %arg0, %c0_i32, %c0_i32_0 : i32, i32, i32
  }
  func.func @transform_1(%arg0: i32) -> (i32, i32) {
    %c0_i32 = arith.constant 0 : i32
    %c0_i32_0 = arith.constant 0 : i32
    %c0_i32_1 = arith.constant 0 : i32
    return %c0_i32, %c0_i32_0 : i32, i32
  }
  func.func @transform_2(%arg0: i32) -> (i32, i32) {
    %c0_i32 = arith.constant 0 : i32
    %c0_i32_0 = arith.constant 0 : i32
    %c0_i32_1 = arith.constant 0 : i32
    return %c0_i32, %c0_i32_0 : i32, i32
  }
  func.func @transform_3(%arg0: i32) -> (i32, i32) {
    %c0_i32 = arith.constant 0 : i32
    %c0_i32_0 = arith.constant 0 : i32
    %c0_i32_1 = arith.constant 0 : i32
    return %c0_i32, %c0_i32_0 : i32, i32
  }
  func.func @transform_4(%arg0: i32) -> (i32, i32) {
    %c0_i32 = arith.constant 0 : i32
    %c0_i32_0 = arith.constant 0 : i32
    %c0_i32_1 = arith.constant 0 : i32
    return %c0_i32, %c0_i32_0 : i32, i32
  }
  func.func @transform_5(%arg0: i32) -> (i32, i32) {
    %c0_i32 = arith.constant 0 : i32
    %c0_i32_0 = arith.constant 0 : i32
    %c0_i32_1 = arith.constant 0 : i32
    return %c0_i32, %c0_i32_0 : i32, i32
  }
  func.func @transform_6(%arg0: i32) -> (i32, i32) {
    %c0_i32 = arith.constant 0 : i32
    %c0_i32_0 = arith.constant 0 : i32
    %c0_i32_1 = arith.constant 0 : i32
    return %c0_i32, %c0_i32_0 : i32, i32
  }
  func.func @transform_7(%arg0: i32) -> (i32, i32) {
    %c0_i32 = arith.constant 0 : i32
    %c0_i32_0 = arith.constant 0 : i32
    %c0_i32_1 = arith.constant 0 : i32
    return %c0_i32, %c0_i32_0 : i32, i32
  }
  func.func @transform_8(%arg0: i32) -> (i32, i32) {
    %c0_i32 = arith.constant 0 : i32
    %c0_i32_0 = arith.constant 0 : i32
    %c0_i32_1 = arith.constant 0 : i32
    return %c0_i32, %c0_i32_0 : i32, i32
  }
  func.func @transform_9(%arg0: i32) -> (i32, i32) {
    %c0_i32 = arith.constant 0 : i32
    %c0_i32_0 = arith.constant 0 : i32
    %c0_i32_1 = arith.constant 0 : i32
    return %c0_i32, %c0_i32_0 : i32, i32
  }
  func.func @transform_10(%arg0: i32) -> (i32, i32) {
    %c0_i32 = arith.constant 0 : i32
    %c0_i32_0 = arith.constant 0 : i32
    %c0_i32_1 = arith.constant 0 : i32
    return %c0_i32, %c0_i32_0 : i32, i32
  }
  func.func @transform_11(%arg0: i32) -> (i32, i32) {
    %c0_i32 = arith.constant 0 : i32
    %c0_i32_0 = arith.constant 0 : i32
    %c0_i32_1 = arith.constant 0 : i32
    return %c0_i32, %c0_i32_0 : i32, i32
  }
  func.func @transform_12(%arg0: i32) -> (i32, i32) {
    %c0_i32 = arith.constant 0 : i32
    %c0_i32_0 = arith.constant 0 : i32
    %c0_i32_1 = arith.constant 0 : i32
    return %c0_i32, %c0_i32_0 : i32, i32
  }
  func.func @transform_13(%arg0: i32) -> (i32, i32) {
    %c0_i32 = arith.constant 0 : i32
    %c0_i32_0 = arith.constant 0 : i32
    %c0_i32_1 = arith.constant 0 : i32
    return %c0_i32, %c0_i32_0 : i32, i32
  }
  func.func @transform_14(%arg0: i32) -> (i32, i32, i32) {
    %c0_i32 = arith.constant 0 : i32
    %c0_i32_0 = arith.constant 0 : i32
    %c0_i32_1 = arith.constant 0 : i32
    return %arg0, %c0_i32, %c0_i32_0 : i32, i32, i32
  }
}

</mosaic_0001>

<bundles_post_ra>
// kernel: c2f_forward_pallas.1
= control target key start
LH: loop header
LB: loop body
LE: loop exit
PB: predicated region body
PF: predicated region fallthrough
CT: control target
= control target key end

     0   :  { %s2180_s29 = smov 0   ;;  %s2569_s0 = inlined_call_operand.vmem [shape: bf16[2,16,384], index: 0, kind: input, shape index: {}]   ;;  %s2570_s1 = inlined_call_operand.vmem [shape: f32[1,384], index: 1, kind: input, shape index: {}]   ;;  %s2571_s2 = inlined_call_operand.vmem [shape: bf16[32,16], index: 2, kind: input, shape index: {}]   ;;  %s2572_s3 = inlined_call_operand.vmem [shape: f32[32,1], index: 3, kind: input, shape index: {}]   ;;  %s2573_s4 = inlined_call_operand.vmem [shape: f32[32,1], index: 4, kind: input, shape index: {}]   ;;  %s2574_s5 = inlined_call_operand.vmem [shape: bf16[16,144], index: 5, kind: input, shape index: {}]   ;;  %s2575_s6 = inlined_call_operand.vmem [shape: f32[16,1], index: 6, kind: input, shape index: {}]   ;;  %s2576_s7 = inlined_call_operand.vmem [shape: f32[16,1], index: 7, kind: input, shape index: {}]   ;;  %s2577_s8 = inlined_call_operand.vmem [shape: bf16[16,144], index: 8, kind: input, shape index: {}]   ;;  %s2578_s9 = inlined_call_operand.vmem [shape: f32[16,1], index: 9, kind: input, shape index: {}]   ;;  %s2579_s10 = inlined_call_operand.vmem [shape: f32[16,1], index: 10, kind: input, shape index: {}]   ;;  %s2580_s11 = inlined_call_operand.vmem [shape: bf16[16,48], index: 11, kind: input, shape index: {}]   ;;  %s2581_s12 = inlined_call_operand.vmem [shape: f32[16,1], index: 12, kind: input, shape index: {}]   ;;  %s2582_s13 = inlined_call_operand.vmem [shape: f32[16,1], index: 13, kind: input, shape index: {}]   ;;  %s2583_s14 = inlined_call_operand.vmem [shape: f32[2,16,384], index: 14, kind: output, shape index: {}]  }
   0x1 LB: > { %s1878_s30 = sadd.s32 4294967295, %s2092_s29   ;;  %p1882_p0 = scmp.ge.s32.totalorder %s2092_s29, 1  ;;  %s2092_s29 = sphi %s2180_s29, %s24_s29  }
   0x2   : > { %p412_p1 = scmp.lt.s32.totalorder %s2092_s29, 3 }
   0x4   : > { %p413_p2 = pnand %p1882_p0, %p412_p1 }
   0x5   : > { %p458_p3 = scmp.lt.s32.totalorder (!%p413_p2), %s1878_s30, 1  ;;  %v2094_v0 = vmov (!%p413_p2), 0   ;;  %v1957_v1 = vld [vmem:[%s2571_s2] sm:$0xff] (!%p413_p2)   ;;  %vm510_vm0 = vcmask (!%p413_p2), 130048   ;;  %v621_v2 = vld [vmem:[%s2572_s3 + $0x10] sm:$0xff] (!%p413_p2)  ;;  %v622_v4 = vld [vmem:[%s2572_s3 + $0x18] sm:$0xff] (!%p413_p2)  ;;  %v764_v53 = vlaneseq (!%p413_p2) }
   0x6   : > { %416 = sbr.rel (%p413_p2) target bundleno = 1386 (0x56a), region = 76  ;;  %549 = vmatprep.mubr.bf16.mxu0 (!%p413_p2), %v2094_v0  ;;  %1951 = vset.pattern.permute.xlu0 (!%p413_p2), %v2094_v0  ;;  %v657_v3 = vld [vmem:[%s2573_s4 + $0x10] sm:$0xff] (!%p413_p2)  ;;  %v658_v5 = vld [vmem:[%s2573_s4 + $0x18] sm:$0xff] (!%p413_p2)  ;;  %v1958_v9 = vld [vmem:[%s2571_s2 + $0x8] sm:$0xff] (!%p413_p2)   ;;  %s2095_s17 = smov (!%p413_p2), 19   ;;  %vm819_vm1 = vcmask (!%p413_p2), 154624  }
   0x7   : > { %1952 = vset.pattern.permute.xlu1 (!%p413_p2), %v2094_v0  ;;  %1916 = vmatprep.mubr.msk.bf16.mxu1 (!%p413_p2), %vm510_vm0, %v1957_v1  ;;  %s2096_s18 = smov (!%p413_p2), 18   ;;  %s2097_s19 = smov (!%p413_p2), 17   ;;  %v765_v55 = vshrl.u32 (!%p413_p2), %v764_v53, 7  ;;  %v469_v63 = vld [vmem:[%s2570_s1] sm:$0x7] (!%p413_p2)  ;;  %vm845_vm2 = vcmask (!%p413_p2), 146432  }
   0x8   : > { %635 = vperm.xlu0 (!%p413_p2), %1951, %v621_v2   ;;  %671 = vperm.xlu1 (!%p413_p2), %1952, %v657_v3   ;;  %s2098_s22 = smov (!%p413_p2), 1   ;;  %s2586_s24 = smov (!%p413_p2), 111   ;;  %vm871_vm3 = vcmask (!%p413_p2), 138240   ;;  %vm897_vm4 = vcmask (!%p413_p2), 7168   ;;  %vm929_vm5 = vcmask (!%p413_p2), 1039360   ;;  %vm955_vm6 = vcmask (!%p413_p2), 908288  }
   0x9   : > { %v774_v60 = vsub.s32 (!%p413_p2), 2, %v765_v55  ;;  %s2584_s25 = smov (!%p413_p2), 110   ;;  %vm981_vm7 = vcmask (!%p413_p2), 900096   ;;  %vm1007_vm8 = vcmask (!%p413_p2), 891904   ;;  %s2588_s15 = smov (!%p413_p2), 111   ;;  %vm2104_vm9 = vmmov (!%p413_p2), 0  }
   0xa   : > { %s2589_s16 = smov (!%p413_p2), 110   ;;  %vm1657_vm10 = vcmask (!%p413_p2), 392192  }
   0xc   : > { %640 = vperm.xlu0 (!%p413_p2), %1951, %v622_v4   ;;  %676 = vperm.xlu1 (!%p413_p2), %1952, %v658_v5   ;;  %v2242_v5 = vrot.slane (!%p413_p2), %v469_v63, %v774_v60 }
   0xd   : > { %s2591_s30 = smov (!%p458_p3, %s1878_s30), 1 }
   0xe   : > { %s1930_s23 = smul.u32 24, %s2591_s30 }
  0x10   : > { %s462_s28 = scalar_lea.vmem %s2569_s0, %s1930_s23  ;;  %811 = vrot.lane.b32.xlu0 %v2094_v0, %s2095_s17  ;;  %837 = vrot.lane.b32.xlu1 %v2094_v0, %s2096_s18  ;;  %s2099_s23 = smov 127  }
  0x11   : > { %v1953_v6 = vld [vmem:[%s462_s28 + $0x4] ss:$12 sps:$4 sm:$0xff]   ;;  %v1955_v7 = vld [vmem:[%s462_s28 + $0x8] ss:$12 sps:$4 sm:$0xff]   ;;  %v1956_v8 = vld [vmem:[%s462_s28] ss:$12 sps:$4 sm:$0xff]  }
  0x12   : > { %517 = vmatprep.subr.bf16.mxu0 %v1953_v6  ;;  %1914 = vmatprep.subr.bf16.mxu1 %v1955_v7  ;;  %s2102_s28 = smov 109  }
  0x13   : > { %518 = vmatpush1.bf16.msra.mxu0 %v1956_v8  ;;  %1915 = vmatpush3.bf16.msra.mxu1 %v1955_v7 }
  0x14   : > { %1101 = vmatprep.subr.bf16.mxu1 %v2094_v0  ;;  %863 = vrot.lane.b32.xlu1 %v2094_v0, %s2097_s19 }
  0x16   : > { %1890 = vmatmul.mubr.msk.bf16.vlgmr.msra.gmra.mrb[0].mxu0 %vm510_vm0, %v1957_v1  ;;  %1917 = vmatmul.mubr.msk.bf16.vlgmr.msra.gmra.mrb[0].mxu1 %vm510_vm0, %v1958_v9 }
  0x17   : > { %559 = vmatprep.mubr.bf16.mxu0 %v2094_v0 }
  0x1e   : > { %1891 = vmatmul.mubr.msk.bf16.gmra.mrb[4].mxu0 %vm510_vm0, %v1958_v9 }
  0x87   : > { %v636_v10 = vpop.permute.xlu0 %635  ;;  %v672_v11 = vpop.permute.xlu1 %671 }
  0x8b   : > { %v641_v12 = vpop.permute.xlu0 %640  ;;  %v677_v24 = vpop.permute.xlu1 %676 }
  0xe9   : > { %v2227_v13 = vpop.f32.mrb[0].mxu0  ;;  %v1918_v14 = vpop.f32.mrb[0].mxu1 }
  0xea   : > { %v651_v15 = vmul.f32 %v1918_v14, %v636_v10  ;;  %v2229_v16 = vpop.f32.mrb[1].mxu0  ;;  %v2231_v17 = vpop.f32.mrb[1].mxu1 }
  0xeb   : > { %v2233_v18 = vpop.f32.mrb[2].mxu0  ;;  %v1919_v19 = vpop.f32.mrb[2].mxu1 }
  0xec   : > { %v687_v20 = vadd.f32 %v672_v11, %v651_v15  ;;  %v654_v21 = vmul.f32 %v1919_v19, %v641_v12  ;;  %v2235_v22 = vpop.f32.mrb[3].mxu0  ;;  %v2237_v23 = vpop.f32.mrb[3].mxu1 }
  0xee   : > { %v699_v25 = vsub.f32 0.0, %v687_v20  ;;  %v690_v26 = vadd.f32 %v677_v24, %v654_v21 }
  0xf0   : > { %v719_v27 = vmul.f32 1.442695, %v699_v25  ;;  %v702_v28 = vsub.f32 0.0, %v690_v26 }
  0xf1   : > { %v561_v29 = vpop.f32.mrb[4].mxu0 }
  0xf2   : > { %1966 = vpow2.f32 %v719_v27  ;;  %v725_v30 = vmul.f32 1.442695, %v702_v28  ;;  %v649_v31 = vmul.f32 %v636_v10, %v561_v29  ;;  %v563_v32 = vpop.f32.mrb[5].mxu0 }
  0xf3   : > { %v650_v33 = vmul.f32 %v636_v10, %v563_v32  ;;  %v565_v34 = vpop.f32.mrb[6].mxu0  ;;  %v766_v10 = vsub.s32 0, %v765_v55 }
  0xf4   : > { %1968 = vpow2.f32 %v725_v30  ;;  %v685_v35 = vadd.f32 %v672_v11, %v649_v31  ;;  %v652_v36 = vmul.f32 %v641_v12, %v565_v34  ;;  %v567_v37 = vpop.f32.mrb[7].mxu0 }
  0xf5   : > { %v686_v38 = vadd.f32 %v672_v11, %v650_v33  ;;  %v653_v39 = vmul.f32 %v641_v12, %v567_v37  ;;  %v770_v11 = vsub.s32 1, %v765_v55  ;;  %v2248_v21 = vrot.slane %v469_v63, %v766_v10  ;;  %v1160_v37 = vld [vmem:[%s2576_s7] sm:$0xff] }
  0xf6   : > { %v697_v40 = vsub.f32 0.0, %v685_v35  ;;  %v688_v41 = vadd.f32 %v677_v24, %v652_v36  ;;  %v1142_v36 = vld [vmem:[%s2575_s6] sm:$0xff] }
  0xf7   : > { %v698_v42 = vsub.f32 0.0, %v686_v38  ;;  %v689_v43 = vadd.f32 %v677_v24, %v653_v39  ;;  %v2252_v25 = vrot.slane %v469_v63, %v770_v11  ;;  %v1161_v39 = vld [vmem:[%s2576_s7 + $0x8] sm:$0xff] }
  0xf8   : > { %v715_v44 = vmul.f32 1.442695, %v697_v40  ;;  %v700_v45 = vsub.f32 0.0, %v688_v41  ;;  %v812_v40 = vpop.permute.xlu0 %811 }
  0xf9   : > { %v717_v46 = vmul.f32 1.442695, %v698_v42  ;;  %v701_v47 = vsub.f32 0.0, %v689_v43 }
  0xfa   : > { %1970 = vpow2.f32 %v715_v44  ;;  %v721_v48 = vmul.f32 1.442695, %v700_v45 }
  0xfb   : > { %1972 = vpow2.f32 %v717_v46  ;;  %v723_v49 = vmul.f32 1.442695, %v701_v47 }
  0xfc   : > { %v1967_v50 = vpop.eup %1966  ;;  %1974 = vpow2.f32 %v721_v48 }
  0xfd   : > { %v735_v51 = vadd.f32 1.0, %v1967_v50  ;;  %1976 = vpow2.f32 %v723_v49 }
  0xfe   : > { %v1969_v52 = vpop.eup %1968 }
  0xff   : > { %1978 = vrcp.f32 %v735_v51  ;;  %v738_v54 = vadd.f32 1.0, %v1969_v52 }
 0x101   : > { %1980 = vrcp.f32 %v738_v54 }
 0x104   : > { %v1971_v56 = vpop.eup %1970 }
 0x105   : > { %v1973_v57 = vpop.eup %1972  ;;  %v733_v58 = vadd.f32 1.0, %v1971_v56 }
 0x106   : > { %v1975_v59 = vpop.eup %1974  ;;  %v734_v61 = vadd.f32 1.0, %v1973_v57 }
 0x107   : > { %v1977_v62 = vpop.eup %1976  ;;  %1982 = vrcp.f32 %v733_v58  ;;  %v736_v1 = vadd.f32 1.0, %v1975_v59 }
 0x108   : > { %1984 = vrcp.f32 %v734_v61  ;;  %v737_v2 = vadd.f32 1.0, %v1977_v62 }
 0x109   : > { %v1979_v3 = vpop.eup %1978  ;;  %1986 = vrcp.f32 %v736_v1 }
 0x10a   : > { %v759_v4 = vmul.f32 %v1979_v3, %v687_v20  ;;  %1988 = vrcp.f32 %v737_v2 }
 0x10b   : > { %v1981_v6 = vpop.eup %1980 }
 0x10c   : > { %v762_v7 = vmul.f32 %v1981_v6, %v690_v26  ;;  %v787_v8 = vmul.f32 %v2242_v5, %v759_v4 }
 0x10e   : > { %v790_v9 = vmul.f32 %v2242_v5, %v762_v7 }
 0x110   : > { %v2246_v12 = vpack.c.bf16 %v790_v9, %v787_v8 }
 0x111   : > { %v1983_v14 = vpop.eup %1982 }
 0x112   : > { %v1985_v15 = vpop.eup %1984  ;;  %v757_v19 = vmul.f32 %v1983_v14, %v685_v35  ;;  %817 = vrot.lane.b32.xlu0 %v2246_v12, %s2095_s17  ;;  %v1961_v35 = vld [vmem:[%s2574_s5 + $0x4] ss:$8 sps:$4 sm:$0xff]  }
 0x113   : > { %v1987_v20 = vpop.eup %1986  ;;  %v758_v24 = vmul.f32 %v1985_v15, %v686_v38  ;;  %1896 = vmatprep.mubr.msk.bf16.mxu0 %vm510_vm0, %v1961_v35  ;;  %1897 = vmatprep.mubr.msk.bf16.mxu1 %vm510_vm0, %v1961_v35  ;;  %v1143_v38 = vld [vmem:[%s2575_s6 + $0x8] sm:$0xff] }
 0x114   : > { %v1989_v26 = vpop.eup %1988  ;;  %v760_v27 = vmul.f32 %v1987_v20, %v688_v41  ;;  %v785_v29 = vmul.f32 %v2248_v21, %v757_v19  ;;  %v838_v41 = vpop.permute.xlu1 %837 }
 0x115   : > { %v761_v28 = vmul.f32 %v1989_v26, %v689_v43  ;;  %v786_v31 = vmul.f32 %v2252_v25, %v758_v24 }
 0x116   : > { %v788_v30 = vmul.f32 %v2248_v21, %v760_v27  ;;  %843 = vrot.lane.b32.xlu0 %v2246_v12, %s2096_s18 }
 0x117   : > { %v789_v32 = vmul.f32 %v2252_v25, %v761_v28 }
 0x118   : > { %v2260_v33 = vpack.c.bf16 %v788_v30, %v785_v29  ;;  %v864_v43 = vpop.permute.xlu1 %863 }
 0x119   : > { %v2262_v34 = vpack.c.bf16 %v789_v32, %v786_v31 }
 0x11a   : > { %839 = vrot.lane.b32.xlu1 %v2260_v33, %s2096_s18  ;;  %813 = vrot.lane.b32.xlu0 %v2260_v33, %s2095_s17 }
 0x11e   : > { %865 = vrot.lane.b32.xlu1 %v2260_v33, %s2097_s19  ;;  %869 = vrot.lane.b32.xlu0 %v2246_v12, %s2097_s19 }
 0x122   : > { %891 = vrot.lane.b32.xlu1 %v2260_v33, %s2098_s22  ;;  %921 = vrot.lane.b32.xlu0 %v2260_v33, %s2099_s23 }
 0x126   : > { %951 = vrot.lane.b32.xlu0 %v2246_v12, %s2586_s24  ;;  %815 = vrot.lane.b32.xlu1 %v2262_v34, %s2095_s17 }
 0x12a   : > { %841 = vrot.lane.b32.xlu0 %v2262_v34, %s2096_s18  ;;  %889 = vrot.lane.b32.xlu1 %v2094_v0, %s2098_s22 }
 0x12e   : > { %867 = vrot.lane.b32.xlu0 %v2262_v34, %s2097_s19  ;;  %895 = vrot.lane.b32.xlu1 %v2246_v12, %s2098_s22 }
 0x132   : > { %893 = vrot.lane.b32.xlu0 %v2262_v34, %s2098_s22  ;;  %925 = vrot.lane.b32.xlu1 %v2246_v12, %s2099_s23 }
 0x136   : > { %927 = vrot.lane.b32.xlu0 %v2094_v0, %s2099_s23  ;;  %947 = vrot.lane.b32.xlu1 %v2260_v33, %s2586_s24 }
 0x13a   : > { %923 = vrot.lane.b32.xlu0 %v2262_v34, %s2099_s23  ;;  %973 = vrot.lane.b32.xlu1 %v2260_v33, %s2584_s25 }
 0x13e   : > { %977 = vrot.lane.b32.xlu0 %v2246_v12, %s2584_s25  ;;  %949 = vrot.lane.b32.xlu1 %v2262_v34, %s2586_s24 }
 0x142   : > { %953 = vrot.lane.b32.xlu0 %v2094_v0, %s2586_s24  ;;  %975 = vrot.lane.b32.xlu1 %v2262_v34, %s2584_s25 }
 0x146   : > { %1003 = vrot.lane.b32.xlu0 %v2246_v12, %s2102_s28  ;;  %1001 = vrot.lane.b32.xlu1 %v2262_v34, %s2102_s28 }
 0x14a   : > { %979 = vrot.lane.b32.xlu0 %v2094_v0, %s2584_s25  ;;  %999 = vrot.lane.b32.xlu1 %v2260_v33, %s2102_s28 }
 0x14e   : > { %1146 = vperm.xlu0 %1951, %v1142_v36   ;;  %1005 = vrot.lane.b32.xlu1 %v2094_v0, %s2102_s28 }
 0x152   : > { %1164 = vperm.xlu0 %1951, %v1160_v37   ;;  %1151 = vperm.xlu1 %1952, %v1143_v38  }
 0x156   : > { %1169 = vperm.xlu1 %1952, %v1161_v39   ;;  %1234 = vrot.lane.b32.xlu0 %v2094_v0, %s2095_s17 }
 0x15a   : > { %1259 = vrot.lane.b32.xlu0 %v2094_v0, %s2096_s18  ;;  %1346 = vrot.lane.b32.xlu1 %v2094_v0, %s2099_s23 }
 0x15e   : > { %1284 = vrot.lane.b32.xlu0 %v2094_v0, %s2097_s19 }
 0x162   : > { %1309 = vrot.lane.b32.xlu0 %v2094_v0, %s2098_s22 }
 0x184   : > { %v818_v42 = vpop.permute.xlu0 %817 }
 0x188   : > { %v844_v44 = vpop.permute.xlu0 %843 }
 0x18c   : > { %v840_v45 = vpop.permute.xlu1 %839  ;;  %v814_v46 = vpop.permute.xlu0 %813 }
 0x18d   : > { %v820_v55 = vsel %vm819_vm1, %v812_v40, %v814_v46  ;;  %v846_v60 = vsel %vm845_vm2, %v838_v41, %v840_v45 }
 0x190   : > { %v866_v47 = vpop.permute.xlu1 %865  ;;  %v870_v48 = vpop.permute.xlu0 %869 }
 0x191   : > { %v872_v2 = vsel %vm871_vm3, %v864_v43, %v866_v47  ;;  %v1959_v43 = vld [vmem:[%s2574_s5] ss:$8 sps:$4 sm:$0xff]  }
 0x194   : > { %v892_v49 = vpop.permute.xlu1 %891  ;;  %v922_v50 = vpop.permute.xlu0 %921 }
 0x198   : > { %v2345_v51 = vpop.permute.xlu0 %951  ;;  %v816_v52 = vpop.permute.xlu1 %815 }
 0x199   : > { %v822_v53 = vsel %vm819_vm1, %v816_v52, %v818_v42  ;;  %v821_v54 = vsel %vm819_vm1, %v814_v46, %v816_v52 }
 0x19a   : > { %1058 = vmatprep.subr.bf16.mxu0 %v821_v54  ;;  %1102 = vmatpush1.bf16.msra.mxu1 %v822_v53 }
 0x19b   : > { %1059 = vmatpush1.bf16.msra.mxu0 %v820_v55  ;;  %1103 = vmatprep.subr.bf16.mxu1 %v2094_v0 }
 0x19c   : > { %v842_v56 = vpop.permute.xlu0 %841  ;;  %v890_v57 = vpop.permute.xlu1 %889 }
 0x19d   : > { %v848_v58 = vsel %vm845_vm2, %v842_v56, %v844_v44  ;;  %v847_v59 = vsel %vm845_vm2, %v840_v45, %v842_v56  ;;  %v898_v8 = vsel %vm897_vm4, %v890_v57, %v892_v49 }
 0x19e   : > { %1060 = vmatprep.subr.bf16.mxu0 %v847_v59  ;;  %1104 = vmatpush1.bf16.msra.mxu1 %v848_v58 }
 0x19f   : > { %1061 = vmatpush1.bf16.msra.mxu0 %v846_v60  ;;  %1105 = vmatprep.subr.bf16.mxu1 %v2094_v0 }
 0x1a0   : > { %v868_v61 = vpop.permute.xlu0 %867  ;;  %v896_v62 = vpop.permute.xlu1 %895 }
 0x1a1   : > { %v874_v63 = vsel %vm871_vm3, %v868_v61, %v870_v48  ;;  %v873_v1 = vsel %vm871_vm3, %v866_v47, %v868_v61 }
 0x1a2   : > { %1062 = vmatprep.subr.bf16.mxu0 %v873_v1  ;;  %1106 = vmatpush1.bf16.msra.mxu1 %v874_v63 }
 0x1a3   : > { %1063 = vmatpush1.bf16.msra.mxu0 %v872_v2  ;;  %1107 = vmatprep.subr.bf16.mxu1 %v2094_v0 }
 0x1a4   : > { %v894_v3 = vpop.permute.xlu0 %893  ;;  %v926_v4 = vpop.permute.xlu1 %925 }
 0x1a5   : > { %v900_v6 = vsel %vm897_vm4, %v894_v3, %v896_v62  ;;  %v899_v7 = vsel %vm897_vm4, %v892_v49, %v894_v3 }
 0x1a6   : > { %1064 = vmatprep.subr.bf16.mxu0 %v899_v7  ;;  %1108 = vmatpush1.bf16.msra.mxu1 %v900_v6 }
 0x1a7   : > { %1065 = vmatpush1.bf16.msra.mxu0 %v898_v8  ;;  %1109 = vmatprep.subr.bf16.mxu1 %v2094_v0 }
 0x1a8   : > { %v928_v9 = vpop.permute.xlu0 %927  ;;  %1066 = vmatprep.subr.bf16.mxu0 %v2262_v34  ;;  %v948_v10 = vpop.permute.xlu1 %947 }
 0x1a9   : > { %v932_v15 = vsel %vm929_vm5, %v926_v4, %v928_v9 }
 0x1aa   : > { %1110 = vmatpush1.bf16.msra.mxu1 %v2246_v12 }
 0x1ab   : > { %1067 = vmatpush1.bf16.msra.mxu0 %v2260_v33  ;;  %1111 = vmatprep.subr.bf16.mxu1 %v2094_v0 }
 0x1ac   : > { %v924_v11 = vpop.permute.xlu0 %923  ;;  %v974_v14 = vpop.permute.xlu1 %973 }
 0x1ad   : > { %v930_v19 = vsel %vm929_vm5, %v922_v50, %v924_v11  ;;  %v931_v20 = vsel %vm929_vm5, %v924_v11, %v926_v4 }
 0x1ae   : > { %1068 = vmatprep.subr.bf16.mxu0 %v931_v20  ;;  %1112 = vmatpush1.bf16.msra.mxu1 %v932_v15 }
 0x1af   : > { %1069 = vmatpush1.bf16.msra.mxu0 %v930_v19  ;;  %1113 = vmatprep.subr.bf16.mxu1 %v2094_v0 }
 0x1b0   : > { %v978_v24 = vpop.permute.xlu0 %977  ;;  %v950_v26 = vpop.permute.xlu1 %949 }
 0x1b1   : > { %v956_v27 = vsel %vm955_vm6, %v948_v10, %v950_v26  ;;  %v957_v28 = vsel %vm955_vm6, %v950_v26, %v2345_v51 }
 0x1b2   : > { %1070 = vmatprep.subr.bf16.mxu0 %v957_v28 }
 0x1b3   : > { %1071 = vmatpush1.bf16.msra.mxu0 %v956_v27 }
 0x1b4   : > { %v954_v29 = vpop.permute.xlu0 %953  ;;  %v976_v30 = vpop.permute.xlu1 %975 }
 0x1b5   : > { %v958_v31 = vsel %vm955_vm6, %v2345_v51, %v954_v29  ;;  %v982_v32 = vsel %vm981_vm7, %v974_v14, %v976_v30  ;;  %v983_v35 = vsel %vm981_vm7, %v976_v30, %v978_v24 }
 0x1b6   : > { %1072 = vmatprep.subr.bf16.mxu0 %v983_v35  ;;  %1114 = vmatpush1.bf16.msra.mxu1 %v958_v31 }
 0x1b7   : > { %1073 = vmatpush1.bf16.msra.mxu0 %v982_v32  ;;  %1115 = vmatprep.subr.bf16.mxu1 %v2094_v0 }
 0x1b8   : > { %v1004_v36 = vpop.permute.xlu0 %1003  ;;  %v1002_v37 = vpop.permute.xlu1 %1001 }
 0x1b9   : > { %v1009_v38 = vsel %vm1007_vm8, %v1002_v37, %v1004_v36 }
 0x1ba   : > { %1074 = vmatprep.subr.bf16.mxu0 %v1009_v38 }
 0x1bc   : > { %v980_v39 = vpop.permute.xlu0 %979  ;;  %v1000_v40 = vpop.permute.xlu1 %999 }
 0x1bd   : > { %v984_v41 = vsel %vm981_vm7, %v978_v24, %v980_v39  ;;  %v1008_v42 = vsel %vm1007_vm8, %v1000_v40, %v1002_v37 }
 0x1be   : > { %1075 = vmatpush1.bf16.msra.mxu0 %v1008_v42  ;;  %1116 = vmatpush1.bf16.msra.mxu1 %v984_v41 }
 0x1bf   : > { %1117 = vmatprep.subr.bf16.mxu1 %v2094_v0 }
 0x1c0   : > { %v1006_v44 = vpop.permute.xlu1 %1005 }
 0x1c1   : > { %v1010_v45 = vsel %vm1007_vm8, %v1004_v36, %v1006_v44  ;;  %1091 = vmatmul.mubr.bf16.vlgmr.msra.gmra.mrb[8].mxu0 %v1959_v43 }
 0x1c2   : > { %1118 = vmatpush1.bf16.msra.mxu1 %v1010_v45 }
 0x1c3   : > { %1516 = vmatprep.subr.bf16.mxu1 %v2094_v0 }
 0x1c5   : > { %1134 = vmatmul.mubr.bf16.vlgmr.msra.gmra.mrb[4].mxu1 %v1959_v43 }
 0x1cd   : > { %v1147_v46 = vpop.permute.xlu0 %1146 }
 0x1d1   : > { %v1152_v47 = vpop.permute.xlu1 %1151  ;;  %v1165_v51 = vpop.permute.xlu0 %1164 }
 0x1d5   : > { %v1170_v57 = vpop.permute.xlu1 %1169 }
 0x294   : > { %v1092_v48 = vpop.f32.mrb[8].mxu0 }
 0x295   : > { %v1154_v49 = vmul.f32 %v1147_v46, %v1092_v48  ;;  %v1094_v50 = vpop.f32.mrb[9].mxu0 }
 0x296   : > { %v1155_v52 = vmul.f32 %v1147_v46, %v1094_v50  ;;  %v1096_v53 = vpop.f32.mrb[10].mxu0 }
 0x297   : > { %v1172_v54 = vadd.f32 %v1165_v51, %v1154_v49  ;;  %v1157_v55 = vmul.f32 %v1152_v47, %v1096_v53  ;;  %v1098_v56 = vpop.f32.mrb[11].mxu0 }
 0x298   : > { %v1173_v58 = vadd.f32 %v1165_v51, %v1155_v52  ;;  %v1158_v59 = vmul.f32 %v1152_v47, %v1098_v56  ;;  %v1135_v60 = vpop.f32.mrb[4].mxu1 }
 0x299   : > { %v1178_v61 = vsub.f32 0.0, %v1172_v54  ;;  %v1175_v62 = vadd.f32 %v1170_v57, %v1157_v55  ;;  %v1156_v63 = vmul.f32 %v1147_v46, %v1135_v60  ;;  %v1137_v1 = vpop.f32.mrb[5].mxu1 }
 0x29a   : > { %v1179_v2 = vsub.f32 0.0, %v1173_v58  ;;  %v1176_v3 = vadd.f32 %v1170_v57, %v1158_v59  ;;  %v1138_v4 = vpop.f32.mrb[6].mxu1  ;;  %v619_v1 = vld [vmem:[%s2572_s3] sm:$0xff] }
 0x29b   : > { %v1184_v6 = vmul.f32 1.442695, %v1178_v61  ;;  %v1181_v7 = vsub.f32 0.0, %v1175_v62  ;;  %v1174_v8 = vadd.f32 %v1165_v51, %v1156_v63  ;;  %v1159_v9 = vmul.f32 %v1152_v47, %v1138_v4  ;;  %v1140_v10 = vpop.f32.mrb[7].mxu1  ;;  %v1557_v4 = vld [vmem:[%s2578_s9] sm:$0xff] }
 0x29c   : > { %v1186_v11 = vmul.f32 1.442695, %v1179_v2  ;;  %v1182_v14 = vsub.f32 0.0, %v1176_v3  ;;  %v1962_v2 = vld [vmem:[%s2577_s8 + $0x4] ss:$8 sps:$4 sm:$0xff]  }
 0x29d   : > { %1990 = vpow2.f32 %v1184_v6  ;;  %v1190_v15 = vmul.f32 1.442695, %v1181_v7  ;;  %v1180_v19 = vsub.f32 0.0, %v1174_v8  ;;  %v1177_v20 = vadd.f32 %v1170_v57, %v1159_v9  ;;  %1900 = vmatprep.mubr.msk.bf16.mxu0 %vm510_vm0, %v1962_v2  ;;  %1901 = vmatprep.mubr.msk.bf16.mxu1 %vm510_vm0, %v1962_v2  ;;  %v1575_v6 = vld [vmem:[%s2579_s10] sm:$0xff]  ;;  %v620_v7 = vld [vmem:[%s2572_s3 + $0x8] sm:$0xff] }
 0x29e   : > { %1992 = vpow2.f32 %v1186_v11  ;;  %v1192_v24 = vmul.f32 1.442695, %v1182_v14  ;;  %v656_v9 = vld [vmem:[%s2573_s4 + $0x8] sm:$0xff]  ;;  %v1763_v10 = vld [vmem:[%s2582_s13] sm:$0xff] }
 0x29f   : > { %1994 = vpow2.f32 %v1190_v15  ;;  %v1188_v26 = vmul.f32 1.442695, %v1180_v19  ;;  %v1183_v27 = vsub.f32 0.0, %v1177_v20  ;;  %v1558_v11 = vld [vmem:[%s2578_s9 + $0x8] sm:$0xff] }
 0x2a0   : > { %1996 = vpow2.f32 %v1192_v24  ;;  %v1576_v14 = vld [vmem:[%s2579_s10 + $0x8] sm:$0xff] }
 0x2a1   : > { %1998 = vpow2.f32 %v1188_v26  ;;  %v1194_v28 = vmul.f32 1.442695, %v1183_v27  ;;  %v1746_v15 = vld [vmem:[%s2581_s12 + $0x8] sm:$0xff] }
 0x2a2   : > { %v1764_v19 = vld [vmem:[%s2582_s13 + $0x8] sm:$0xff] }
 0x2a3   : > { %2000 = vpow2.f32 %v1194_v28  ;;  %v1347_v28 = vpop.permute.xlu1 %1346 }
 0x2a7   : > { %v1991_v29 = vpop.eup %1990 }
 0x2a8   : > { %v1993_v30 = vpop.eup %1992  ;;  %v1196_v31 = vadd.f32 1.0, %v1991_v29 }
 0x2a9   : > { %v1995_v32 = vpop.eup %1994  ;;  %v1197_v35 = vadd.f32 1.0, %v1993_v30 }
 0x2aa   : > { %v1997_v36 = vpop.eup %1996  ;;  %2002 = vrcp.f32 %v1196_v31  ;;  %v1199_v37 = vadd.f32 1.0, %v1995_v32 }
 0x2ab   : > { %v1999_v38 = vpop.eup %1998  ;;  %2004 = vrcp.f32 %v1197_v35  ;;  %v1200_v39 = vadd.f32 1.0, %v1997_v36 }
 0x2ac   : > { %2006 = vrcp.f32 %v1199_v37  ;;  %v1198_v40 = vadd.f32 1.0, %v1999_v38 }
 0x2ad   : > { %v2001_v41 = vpop.eup %2000  ;;  %2008 = vrcp.f32 %v1200_v39 }
 0x2ae   : > { %2010 = vrcp.f32 %v1198_v40  ;;  %v1201_v42 = vadd.f32 1.0, %v2001_v41 }
 0x2b0   : > { %2012 = vrcp.f32 %v1201_v42 }
 0x2b4   : > { %v2003_v43 = vpop.eup %2002 }
 0x2b5   : > { %v2005_v44 = vpop.eup %2004  ;;  %v1208_v45 = vmul.f32 %v2003_v43, %v1172_v54 }
 0x2b6   : > { %v2007_v46 = vpop.eup %2006  ;;  %v1209_v47 = vmul.f32 %v2005_v44, %v1173_v58 }
 0x2b7   : > { %v2009_v48 = vpop.eup %2008  ;;  %v1211_v49 = vmul.f32 %v2007_v46, %v1175_v62  ;;  %v1214_v52 = vmul.f32 %v1208_v45, %v2248_v21 }
 0x2b8   : > { %v2011_v50 = vpop.eup %2010  ;;  %v1212_v51 = vmul.f32 %v2009_v48, %v1176_v3  ;;  %v1215_v57 = vmul.f32 %v1209_v47, %v2252_v25  ;;  %v655_v3 = vld [vmem:[%s2573_s4] sm:$0xff] }
 0x2b9   : > { %v1217_v53 = vmul.f32 %v1211_v49, %v2248_v21  ;;  %v1210_v55 = vmul.f32 %v2011_v50, %v1174_v8  ;;  %v1745_v8 = vld [vmem:[%s2581_s12] sm:$0xff] }
 0x2ba   : > { %v2013_v56 = vpop.eup %2012  ;;  %v1218_v59 = vmul.f32 %v1212_v51, %v2252_v25 }
 0x2bb   : > { %v2392_v60 = vpack.c.bf16 %v1217_v53, %v1214_v52  ;;  %v1213_v61 = vmul.f32 %v2013_v56, %v1177_v20  ;;  %v1216_v58 = vmul.f32 %v1210_v55, %v2242_v5  ;;  %v1235_v20 = vpop.permute.xlu0 %1234 }
 0x2bc   : > { %v2394_v54 = vpack.c.bf16 %v1218_v59, %v1215_v57 }
 0x2bd   : > { %v1219_v62 = vmul.f32 %v1213_v61, %v2242_v5  ;;  %1236 = vrot.lane.b32.xlu0 %v2392_v60, %s2095_s17 }
 0x2bf   : > { %v2400_v63 = vpack.c.bf16 %v1219_v62, %v1216_v58  ;;  %v1260_v24 = vpop.permute.xlu0 %1259 }
 0x2c1   : > { %1240 = vrot.lane.b32.xlu1 %v2400_v63, %s2095_s17  ;;  %1261 = vrot.lane.b32.xlu0 %v2392_v60, %s2096_s18 }
 0x2c3   : > { %v1285_v26 = vpop.permute.xlu0 %1284 }
 0x2c5   : > { %1265 = vrot.lane.b32.xlu1 %v2400_v63, %s2096_s18  ;;  %1286 = vrot.lane.b32.xlu0 %v2392_v60, %s2097_s19 }
 0x2c7   : > { %v1310_v27 = vpop.permute.xlu0 %1309 }
 0x2c9   : > { %1290 = vrot.lane.b32.xlu1 %v2400_v63, %s2097_s19  ;;  %1311 = vrot.lane.b32.xlu0 %v2392_v60, %s2098_s22 }
 0x2cd   : > { %1315 = vrot.lane.b32.xlu1 %v2400_v63, %s2098_s22  ;;  %1340 = vrot.lane.b32.xlu0 %v2392_v60, %s2099_s23 }
 0x2d1   : > { %1344 = vrot.lane.b32.xlu1 %v2400_v63, %s2099_s23  ;;  %1365 = vrot.lane.b32.xlu0 %v2392_v60, %s2588_s15 }
 0x2d5   : > { %1238 = vrot.lane.b32.xlu1 %v2394_v54, %s2095_s17  ;;  %1390 = vrot.lane.b32.xlu0 %v2392_v60, %s2589_s16 }
 0x2d9   : > { %1263 = vrot.lane.b32.xlu1 %v2394_v54, %s2096_s18  ;;  %1342 = vrot.lane.b32.xlu0 %v2394_v54, %s2099_s23 }
 0x2dd   : > { %1288 = vrot.lane.b32.xlu1 %v2394_v54, %s2097_s19  ;;  %1367 = vrot.lane.b32.xlu0 %v2394_v54, %s2588_s15 }
 0x2e1   : > { %1313 = vrot.lane.b32.xlu1 %v2394_v54, %s2098_s22  ;;  %1392 = vrot.lane.b32.xlu0 %v2394_v54, %s2589_s16  ;;  %s1931_s22 = smul.u32 48, %s2591_s30 }
 0x2e3   : > { %s467_s20 = scalar_lea.vmem %s2583_s14, %s1931_s22 }
 0x2e5   : > { %1369 = vrot.lane.b32.xlu1 %v2400_v63, %s2588_s15  ;;  %1417 = vrot.lane.b32.xlu0 %v2394_v54, %s2102_s28 }
 0x2e9   : > { %1371 = vrot.lane.b32.xlu1 %v2094_v0, %s2588_s15  ;;  %1415 = vrot.lane.b32.xlu0 %v2392_v60, %s2102_s28 }
 0x2ed   : > { %1394 = vrot.lane.b32.xlu1 %v2400_v63, %s2589_s16  ;;  %625 = vperm.xlu0 %1951, %v619_v1  }
 0x2f1   : > { %1396 = vrot.lane.b32.xlu1 %v2094_v0, %s2589_s16  ;;  %661 = vperm.xlu0 %1951, %v655_v3  }
 0x2f5   : > { %1419 = vrot.lane.b32.xlu1 %v2400_v63, %s2102_s28  ;;  %1561 = vperm.xlu0 %1951, %v1557_v4  }
 0x2f9   : > { %1421 = vrot.lane.b32.xlu1 %v2094_v0, %s2102_s28  ;;  %1579 = vperm.xlu0 %1951, %v1575_v6  }
 0x2fd   : > { %630 = vperm.xlu1 %1952, %v620_v7   ;;  %1749 = vperm.xlu0 %1951, %v1745_v8  }
 0x301   : > { %666 = vperm.xlu1 %1952, %v656_v9   ;;  %1767 = vperm.xlu0 %1951, %v1763_v10  }
 0x305   : > { %1566 = vperm.xlu1 %1952, %v1558_v11  }
 0x309   : > { %1584 = vperm.xlu1 %1952, %v1576_v14  }
 0x30d   : > { %1754 = vperm.xlu1 %1952, %v1746_v15  }
 0x311   : > { %1772 = vperm.xlu1 %1952, %v1764_v19  }
 0x32f   : > { %v1237_v29 = vpop.permute.xlu0 %1236 }
 0x330   : > { %v1242_v46 = vsel %vm819_vm1, %v1235_v20, %v1237_v29 }
 0x333   : > { %v1262_v30 = vpop.permute.xlu0 %1261  ;;  %v1241_v31 = vpop.permute.xlu1 %1240 }
 0x334   : > { %v1267_v50 = vsel %vm845_vm2, %v1260_v24, %v1262_v30 }
 0x337   : > { %v1287_v32 = vpop.permute.xlu0 %1286  ;;  %v1266_v35 = vpop.permute.xlu1 %1265 }
 0x338   : > { %v1292_v56 = vsel %vm871_vm3, %v1285_v26, %v1287_v32 }
 0x33b   : > { %v1312_v36 = vpop.permute.xlu0 %1311  ;;  %v1291_v37 = vpop.permute.xlu1 %1290 }
 0x33c   : > { %v1317_v62 = vsel %vm897_vm4, %v1310_v27, %v1312_v36  ;;  %v1964_v27 = vld [vmem:[%s2577_s8] ss:$8 sps:$4 sm:$0xff]  }
 0x33f   : > { %v1341_v38 = vpop.permute.xlu0 %1340  ;;  %v1316_v39 = vpop.permute.xlu1 %1315 }
 0x343   : > { %v1366_v40 = vpop.permute.xlu0 %1365  ;;  %v1345_v41 = vpop.permute.xlu1 %1344 }
 0x344   : > { %v1350_v6 = vsel %vm929_vm5, %v1345_v41, %v1347_v28 }
 0x347   : > { %v1239_v42 = vpop.permute.xlu1 %1238  ;;  %v1391_v43 = vpop.permute.xlu0 %1390 }
 0x348   : > { %v1244_v44 = vsel %vm819_vm1, %v1239_v42, %v1241_v31  ;;  %v1243_v45 = vsel %vm819_vm1, %v1237_v29, %v1239_v42  ;;  %v2103_v31 = vmov 0.0  }
 0x349   : > { %1473 = vmatprep.subr.bf16.mxu0 %v1243_v45  ;;  %1517 = vmatpush1.bf16.msra.mxu1 %v1244_v44 }
 0x34a   : > { %1474 = vmatpush1.bf16.msra.mxu0 %v1242_v46  ;;  %1518 = vmatprep.subr.bf16.mxu1 %v2094_v0 }
 0x34b   : > { %v1264_v47 = vpop.permute.xlu1 %1263  ;;  %v1343_v51 = vpop.permute.xlu0 %1342 }
 0x34c   : > { %v1269_v48 = vsel %vm845_vm2, %v1264_v47, %v1266_v35  ;;  %v1268_v49 = vsel %vm845_vm2, %v1262_v30, %v1264_v47  ;;  %v1349_v3 = vsel %vm929_vm5, %v1343_v51, %v1345_v41  ;;  %v1348_v7 = vsel %vm929_vm5, %v1341_v38, %v1343_v51 }
 0x34d   : > { %1475 = vmatprep.subr.bf16.mxu0 %v1268_v49  ;;  %1519 = vmatpush1.bf16.msra.mxu1 %v1269_v48 }
 0x34e   : > { %1476 = vmatpush1.bf16.msra.mxu0 %v1267_v50  ;;  %1520 = vmatprep.subr.bf16.mxu1 %v2094_v0 }
 0x34f   : > { %v1289_v52 = vpop.permute.xlu1 %1288  ;;  %v1368_v59 = vpop.permute.xlu0 %1367 }
 0x350   : > { %v1294_v53 = vsel %vm871_vm3, %v1289_v52, %v1291_v37  ;;  %v1293_v55 = vsel %vm871_vm3, %v1287_v32, %v1289_v52  ;;  %v1373_v9 = vsel %vm955_vm6, %v1366_v40, %v1368_v59 }
 0x351   : > { %1477 = vmatprep.subr.bf16.mxu0 %v1293_v55  ;;  %1521 = vmatpush1.bf16.msra.mxu1 %v1294_v53 }
 0x352   : > { %1478 = vmatpush1.bf16.msra.mxu0 %v1292_v56  ;;  %1522 = vmatprep.subr.bf16.mxu1 %v2094_v0 }
 0x353   : > { %v1314_v57 = vpop.permute.xlu1 %1313  ;;  %v1393_v2 = vpop.permute.xlu0 %1392 }
 0x354   : > { %v1319_v61 = vsel %vm897_vm4, %v1314_v57, %v1316_v39  ;;  %v1318_v58 = vsel %vm897_vm4, %v1312_v36, %v1314_v57  ;;  %v1398_v15 = vsel %vm981_vm7, %v1391_v43, %v1393_v2 }
 0x355   : > { %1479 = vmatprep.subr.bf16.mxu0 %v1318_v58  ;;  %1523 = vmatpush1.bf16.msra.mxu1 %v1319_v61 }
 0x356   : > { %1480 = vmatpush1.bf16.msra.mxu0 %v1317_v62  ;;  %1524 = vmatprep.subr.bf16.mxu1 %v2094_v0 }
 0x357   : > { %1481 = vmatprep.subr.bf16.mxu0 %v2394_v54  ;;  %v1370_v1 = vpop.permute.xlu1 %1369  ;;  %v1418_v8 = vpop.permute.xlu0 %1417 }
 0x358   : > { %v1374_v54 = vsel %vm955_vm6, %v1368_v59, %v1370_v1 }
 0x359   : > { %1525 = vmatpush1.bf16.msra.mxu1 %v2400_v63 }
 0x35a   : > { %1482 = vmatpush1.bf16.msra.mxu0 %v2392_v60  ;;  %1526 = vmatprep.subr.bf16.mxu1 %v2094_v0 }
 0x35b   : > { %1483 = vmatprep.subr.bf16.mxu0 %v1349_v3  ;;  %v1372_v4 = vpop.permute.xlu1 %1371  ;;  %v1416_v19 = vpop.permute.xlu0 %1415 }
 0x35c   : > { %v1375_v60 = vsel %vm955_vm6, %v1370_v1, %v1372_v4  ;;  %v1423_v26 = vsel %vm1007_vm8, %v1416_v19, %v1418_v8 }
 0x35d   : > { %1527 = vmatpush1.bf16.msra.mxu1 %v1350_v6 }
 0x35e   : > { %1484 = vmatpush1.bf16.msra.mxu0 %v1348_v7  ;;  %1528 = vmatprep.subr.bf16.mxu1 %v2094_v0 }
 0x35f   : > { %1485 = vmatprep.subr.bf16.mxu0 %v1374_v54  ;;  %v1395_v63 = vpop.permute.xlu1 %1394 }
 0x360   : > { %v1399_v10 = vsel %vm981_vm7, %v1393_v2, %v1395_v63 }
 0x361   : > { %1529 = vmatpush1.bf16.msra.mxu1 %v1375_v60 }
 0x362   : > { %1486 = vmatpush1.bf16.msra.mxu0 %v1373_v9  ;;  %1530 = vmatprep.subr.bf16.mxu1 %v2094_v0 }
 0x363   : > { %1487 = vmatprep.subr.bf16.mxu0 %v1399_v10  ;;  %v1397_v11 = vpop.permute.xlu1 %1396 }
 0x364   : > { %v1400_v14 = vsel %vm981_vm7, %v1395_v63, %v1397_v11 }
 0x365   : > { %1531 = vmatpush1.bf16.msra.mxu1 %v1400_v14 }
 0x366   : > { %1488 = vmatpush1.bf16.msra.mxu0 %v1398_v15  ;;  %1532 = vmatprep.subr.bf16.mxu1 %v2094_v0 }
 0x367   : > { %v1420_v20 = vpop.permute.xlu1 %1419 }
 0x368   : > { %v1424_v24 = vsel %vm1007_vm8, %v1418_v8, %v1420_v20 }
 0x369   : > { %1489 = vmatprep.subr.bf16.mxu0 %v1424_v24 }
 0x36a   : > { %1490 = vmatpush1.bf16.msra.mxu0 %v1423_v26 }
 0x36b   : > { %v1422_v28 = vpop.permute.xlu1 %1421 }
 0x36c   : > { %v1425_v29 = vsel %vm1007_vm8, %v1420_v20, %v1422_v28  ;;  %v626_v30 = vpop.permute.xlu0 %625 }
 0x36d   : > { %1506 = vmatmul.mubr.bf16.vlgmr.msra.gmra.mrb[12].mxu0 %v1964_v27  ;;  %1533 = vmatpush1.bf16.msra.mxu1 %v1425_v29  ;;  %v643_v35 = vmul.f32 %v626_v30, %v2227_v13  ;;  %v644_v36 = vmul.f32 %v626_v30, %v2229_v16  ;;  %v645_v37 = vmul.f32 %v626_v30, %v2231_v17 }
 0x36e   : > { %1920 = vmatprep.subr.bf16.mxu1 %v2103_v31  ;;  %1693 = vmatprep.mubr.bf16.mxu0 %v2094_v0 }
 0x370   : > { %v662_v32 = vpop.permute.xlu0 %661  ;;  %1549 = vmatmul.mubr.bf16.vlgmr.msra.gmra.mrb[8].mxu1 %v1964_v27 }
 0x371   : > { %v679_v38 = vadd.f32 %v662_v32, %v643_v35  ;;  %v680_v39 = vadd.f32 %v662_v32, %v644_v36  ;;  %v681_v40 = vadd.f32 %v662_v32, %v645_v37  ;;  %1926 = vmatprep.mubr.msk.bf16.mxu1 %vm2104_vm9, %v2103_v31 }
 0x373   : > { %v691_v41 = vsub.f32 0.0, %v679_v38  ;;  %v692_v42 = vsub.f32 0.0, %v680_v39  ;;  %v693_v43 = vsub.f32 0.0, %v681_v40 }
 0x374   : > { %v1562_v37 = vpop.permute.xlu0 %1561 }
 0x375   : > { %v703_v44 = vmul.f32 1.442695, %v691_v41  ;;  %v705_v45 = vmul.f32 1.442695, %v692_v42  ;;  %v707_v47 = vmul.f32 1.442695, %v693_v43 }
 0x377   : > { %2014 = vpow2.f32 %v703_v44 }
 0x378   : > { %2016 = vpow2.f32 %v705_v45  ;;  %v1580_v42 = vpop.permute.xlu0 %1579 }
 0x379   : > { %2018 = vpow2.f32 %v707_v47 }
 0x37c   : > { %v631_v46 = vpop.permute.xlu1 %630 }
 0x37d   : > { %v646_v0 = vmul.f32 %v631_v46, %v2233_v18  ;;  %v647_v48 = vmul.f32 %v631_v46, %v2235_v22  ;;  %v648_v13 = vmul.f32 %v631_v46, %v2237_v23 }
 0x380   : > { %v667_v16 = vpop.permute.xlu1 %666 }
 0x381   : > { %v682_v17 = vadd.f32 %v667_v16, %v646_v0  ;;  %v683_v49 = vadd.f32 %v667_v16, %v647_v48  ;;  %v684_v50 = vadd.f32 %v667_v16, %v648_v13  ;;  %v2015_v59 = vpop.eup %2014 }
 0x382   : > { %v2017_v18 = vpop.eup %2016  ;;  %v727_v61 = vadd.f32 1.0, %v2015_v59 }
 0x383   : > { %v694_v51 = vsub.f32 0.0, %v682_v17  ;;  %v695_v52 = vsub.f32 0.0, %v683_v49  ;;  %v696_v53 = vsub.f32 0.0, %v684_v50  ;;  %v2019_v22 = vpop.eup %2018  ;;  %v728_v23 = vadd.f32 1.0, %v2017_v18 }
 0x384   : > { %v729_v58 = vadd.f32 1.0, %v2019_v22 }
 0x385   : > { %v709_v55 = vmul.f32 1.442695, %v694_v51  ;;  %v711_v56 = vmul.f32 1.442695, %v695_v52  ;;  %v713_v57 = vmul.f32 1.442695, %v696_v53 }
 0x387   : > { %2020 = vpow2.f32 %v709_v55 }
 0x388   : > { %2022 = vpow2.f32 %v711_v56 }
 0x389   : > { %2024 = vpow2.f32 %v713_v57 }
 0x38a   : > { %2026 = vrcp.f32 %v727_v61 }
 0x38b   : > { %2028 = vrcp.f32 %v728_v23 }
 0x38c   : > { %2030 = vrcp.f32 %v729_v58 }
 0x391   : > { %v2021_v62 = vpop.eup %2020 }
 0x392   : > { %v2023_v1 = vpop.eup %2022  ;;  %v730_v2 = vadd.f32 1.0, %v2021_v62 }
 0x393   : > { %v2025_v3 = vpop.eup %2024  ;;  %v731_v4 = vadd.f32 1.0, %v2023_v1 }
 0x394   : > { %v732_v6 = vadd.f32 1.0, %v2025_v3  ;;  %2032 = vrcp.f32 %v730_v2  ;;  %v2027_v7 = vpop.eup %2026 }
 0x395   : > { %2034 = vrcp.f32 %v731_v4  ;;  %v2029_v54 = vpop.eup %2028  ;;  %v751_v8 = vmul.f32 %v2027_v7, %v679_v38  ;;  %v1567_v38 = vpop.permute.xlu1 %1566 }
 0x396   : > { %2036 = vrcp.f32 %v732_v6  ;;  %v2031_v63 = vpop.eup %2030  ;;  %v752_v9 = vmul.f32 %v2029_v54, %v680_v39 }
 0x397   : > { %v753_v11 = vmul.f32 %v2031_v63, %v681_v40  ;;  %v779_v20 = vmul.f32 %v2248_v21, %v751_v8 }
 0x398   : > { %v780_v27 = vmul.f32 %v2252_v25, %v752_v9 }
 0x399   : > { %v781_v29 = vmul.f32 %v2242_v5, %v753_v11 }
 0x39e   : > { %v2033_v60 = vpop.eup %2032 }
 0x39f   : > { %v2035_v10 = vpop.eup %2034  ;;  %v754_v14 = vmul.f32 %v2033_v60, %v682_v17 }
 0x3a0   : > { %v2037_v15 = vpop.eup %2036  ;;  %v755_v19 = vmul.f32 %v2035_v10, %v683_v49 }
 0x3a1   : > { %v756_v24 = vmul.f32 %v2037_v15, %v684_v50  ;;  %v782_v26 = vmul.f32 %v2248_v21, %v754_v14 }
 0x3a2   : > { %v783_v28 = vmul.f32 %v2252_v25, %v755_v19 }
 0x3a3   : > { %v784_v30 = vmul.f32 %v2242_v5, %v756_v24  ;;  %v791_v32 = vpack.c.bf16 %v782_v26, %v779_v20 }
 0x3a4   : > { %v792_v35 = vpack.c.bf16 %v783_v28, %v780_v27 }
 0x3a5   : > { %v793_v36 = vpack.c.bf16 %v784_v30, %v781_v29 }
 0x3a6   : > { %1661 = vmatprep.subr.bf16.mxu0 %v792_v35 }
 0x3a7   : > { %1921 = vmatpush3.bf16.msra.mxu1 %v793_v36  ;;  %1662 = vmatpush1.bf16.msra.mxu0 %v791_v32 }
 0x3a8   : > { %1663 = vmatprep.subr.bf16.mxu0 %v2262_v34  ;;  %1922 = vmatprep.subr.bf16.mxu1 %v2103_v31 }
 0x3ab   : > { %1923 = vmatpush3.bf16.msra.mxu1 %v2246_v12  ;;  %1664 = vmatpush1.bf16.msra.mxu0 %v2260_v33  ;;  %v1585_v12 = vpop.permute.xlu1 %1584 }
 0x3ac   : > { %1924 = vmatprep.subr.bf16.mxu1 %v2103_v31 }
 0x440   : > { %v1507_v39 = vpop.f32.mrb[12].mxu0 }
 0x441   : > { %v1569_v40 = vmul.f32 %v1562_v37, %v1507_v39  ;;  %v1509_v41 = vpop.f32.mrb[13].mxu0 }
 0x442   : > { %v1570_v43 = vmul.f32 %v1562_v37, %v1509_v41  ;;  %v1511_v44 = vpop.f32.mrb[14].mxu0 }
 0x443   : > { %v1587_v34 = vadd.f32 %v1580_v42, %v1569_v40  ;;  %v1572_v45 = vmul.f32 %v1567_v38, %v1511_v44  ;;  %v1513_v46 = vpop.f32.mrb[15].mxu0  ;;  %v1550_v47 = vpop.f32.mrb[8].mxu1 }
 0x444   : > { %v1588_v0 = vadd.f32 %v1580_v42, %v1570_v43  ;;  %v1573_v33 = vmul.f32 %v1567_v38, %v1513_v46  ;;  %v1571_v48 = vmul.f32 %v1562_v37, %v1550_v47  ;;  %v1552_v13 = vpop.f32.mrb[9].mxu1 }
 0x445   : > { %v1593_v16 = vsub.f32 0.0, %v1587_v34  ;;  %v1590_v17 = vadd.f32 %v1585_v12, %v1572_v45  ;;  %v1553_v31 = vpop.f32.mrb[10].mxu1  ;;  %v1755_v45 = vpop.permute.xlu1 %1754 }
 0x446   : > { %v1594_v49 = vsub.f32 0.0, %v1588_v0  ;;  %v1591_v50 = vadd.f32 %v1585_v12, %v1573_v33  ;;  %v1589_v51 = vadd.f32 %v1580_v42, %v1571_v48  ;;  %v1574_v52 = vmul.f32 %v1567_v38, %v1553_v31  ;;  %v1555_v53 = vpop.f32.mrb[11].mxu1 }
 0x447   : > { %v1599_v55 = vmul.f32 1.442695, %v1593_v16  ;;  %v1596_v56 = vsub.f32 0.0, %v1590_v17 }
 0x448   : > { %v1601_v57 = vmul.f32 1.442695, %v1594_v49  ;;  %v1597_v59 = vsub.f32 0.0, %v1591_v50  ;;  %v1595_v18 = vsub.f32 0.0, %v1589_v51  ;;  %v1592_v22 = vadd.f32 %v1585_v12, %v1574_v52 }
 0x449   : > { %2038 = vpow2.f32 %v1599_v55  ;;  %v1605_v61 = vmul.f32 1.442695, %v1596_v56 }
 0x44a   : > { %2040 = vpow2.f32 %v1601_v57  ;;  %v1607_v23 = vmul.f32 1.442695, %v1597_v59  ;;  %v1603_v58 = vmul.f32 1.442695, %v1595_v18  ;;  %v1598_v62 = vsub.f32 0.0, %v1592_v22 }
 0x44b   : > { %2042 = vpow2.f32 %v1605_v61 }
 0x44c   : > { %2044 = vpow2.f32 %v1607_v23  ;;  %v1609_v1 = vmul.f32 1.442695, %v1598_v62 }
 0x44d   : > { %2046 = vpow2.f32 %v1603_v58 }
 0x44e   : > { %2048 = vpow2.f32 %v1609_v1 }
 0x453   : > { %v2039_v2 = vpop.eup %2038 }
 0x454   : > { %v2041_v3 = vpop.eup %2040  ;;  %v1611_v4 = vadd.f32 1.0, %v2039_v2 }
 0x455   : > { %v2043_v6 = vpop.eup %2042  ;;  %v1612_v7 = vadd.f32 1.0, %v2041_v3 }
 0x456   : > { %v2045_v54 = vpop.eup %2044  ;;  %2050 = vrcp.f32 %v1611_v4  ;;  %v1614_v63 = vadd.f32 1.0, %v2043_v6 }
 0x457   : > { %v2047_v8 = vpop.eup %2046  ;;  %2052 = vrcp.f32 %v1612_v7  ;;  %v1615_v60 = vadd.f32 1.0, %v2045_v54 }
 0x458   : > { %v2049_v9 = vpop.eup %2048  ;;  %2054 = vrcp.f32 %v1614_v63  ;;  %v1613_v10 = vadd.f32 1.0, %v2047_v8 }
 0x459   : > { %2056 = vrcp.f32 %v1615_v60  ;;  %v1616_v11 = vadd.f32 1.0, %v2049_v9 }
 0x45a   : > { %2058 = vrcp.f32 %v1613_v10 }
 0x45b   : > { %2060 = vrcp.f32 %v1616_v11 }
 0x460   : > { %v2051_v14 = vpop.eup %2050 }
 0x461   : > { %v2053_v15 = vpop.eup %2052  ;;  %v1623_v19 = vmul.f32 %v2051_v14, %v1587_v34  ;;  %v1965_v34 = vld [vmem:[%s2580_s11] sm:$0xff]  }
 0x462   : > { %v2055_v20 = vpop.eup %2054  ;;  %v1624_v24 = vmul.f32 %v2053_v15, %v1588_v0 }
 0x463   : > { %v2057_v26 = vpop.eup %2056  ;;  %v1626_v27 = vmul.f32 %v2055_v20, %v1590_v17  ;;  %v1629_v32 = vmul.f32 %v1623_v19, %v2248_v21 }
 0x464   : > { %v2059_v28 = vpop.eup %2058  ;;  %v1627_v29 = vmul.f32 %v2057_v26, %v1591_v50  ;;  %v1630_v38 = vmul.f32 %v1624_v24, %v2252_v25  ;;  %v1773_v50 = vpop.permute.xlu1 %1772 }
 0x465   : > { %v2061_v30 = vpop.eup %2060  ;;  %v1632_v35 = vmul.f32 %v1626_v27, %v2248_v21  ;;  %v1625_v36 = vmul.f32 %v2059_v28, %v1589_v51  ;;  %v1750_v21 = vpop.permute.xlu0 %1749 }
 0x466   : > { %v1628_v37 = vmul.f32 %v2061_v30, %v1592_v22  ;;  %v1633_v39 = vmul.f32 %v1627_v29, %v2252_v25 }
 0x467   : > { %v1635_v40 = vpack.c.bf16 %v1632_v35, %v1629_v32  ;;  %v1631_v41 = vmul.f32 %v1625_v36, %v2242_v5 }
 0x468   : > { %v1634_v42 = vmul.f32 %v1628_v37, %v2242_v5  ;;  %v1636_v43 = vpack.c.bf16 %v1633_v39, %v1630_v38 }
 0x469   : > { %v1768_v25 = vpop.permute.xlu0 %1767 }
 0x46a   : > { %1665 = vmatprep.subr.bf16.mxu0 %v1636_v43  ;;  %v1637_v44 = vpack.c.bf16 %v1634_v42, %v1631_v41 }
 0x46b   : > { %1666 = vmatpush1.bf16.msra.mxu0 %v1635_v40 }
 0x46c   : > { %1925 = vmatpush3.bf16.msra.mxu1 %v1637_v44 }
 0x46e   : > { %1903 = vmatmul.mubr.msk.bf16.vlgmr.msra.gmra.mrb[16].mxu0 %vm1657_vm10, %v1965_v34 }
 0x46f   : > { %1927 = vmatmul.mubr.msk.bf16.vlgmr.msra.gmra.mrb[12].mxu1 %vm1657_vm10, %v1965_v34 }
 0x541   : > { %v1695_v46 = vpop.f32.mrb[16].mxu0 }
 0x542   : > { %v1757_v47 = vmul.f32 %v1750_v21, %v1695_v46  ;;  %v1697_v12 = vpop.f32.mrb[17].mxu0  ;;  %v1738_v0 = vpop.f32.mrb[12].mxu1 }
 0x543   : > { %v1758_v5 = vmul.f32 %v1750_v21, %v1697_v12  ;;  %v1759_v33 = vmul.f32 %v1750_v21, %v1738_v0  ;;  %v1699_v48 = vpop.f32.mrb[18].mxu0  ;;  %v1928_v13 = vpop.f32.mrb[13].mxu1 }
 0x544   : > { %v1775_v16 = vadd.f32 %v1768_v25, %v1757_v47  ;;  %v1760_v17 = vmul.f32 %v1755_v45, %v1699_v48  ;;  %v1701_v31 = vpop.f32.mrb[19].mxu0  ;;  %v1741_v49 = vpop.f32.mrb[14].mxu1 }
 0x545   : > { %v1776_v51 = vadd.f32 %v1768_v25, %v1758_v5  ;;  %v1777_v52 = vadd.f32 %v1768_v25, %v1759_v33  ;;  %v1761_v53 = vmul.f32 %v1755_v45, %v1701_v31  ;;  %v1762_v55 = vmul.f32 %v1755_v45, %v1741_v49  ;;  %v1929_v56 = vpop.f32.mrb[15].mxu1 }
 0x546   : > { %v1781_v57 = vsub.f32 0.0, %v1775_v16  ;;  %v1778_v59 = vadd.f32 %v1773_v50, %v1760_v17 }
 0x547   : > { %v1782_v18 = vsub.f32 0.0, %v1776_v51  ;;  %v1783_v22 = vsub.f32 0.0, %v1777_v52  ;;  %v1779_v61 = vadd.f32 %v1773_v50, %v1761_v53  ;;  %v1780_v23 = vadd.f32 %v1773_v50, %v1762_v55 }
 0x548   : > { %v1787_v58 = vmul.f32 1.442695, %v1781_v57  ;;  %v1784_v62 = vsub.f32 0.0, %v1778_v59 }
 0x549   : > { %v1789_v1 = vmul.f32 1.442695, %v1782_v18  ;;  %v1791_v2 = vmul.f32 1.442695, %v1783_v22  ;;  %v1785_v3 = vsub.f32 0.0, %v1779_v61  ;;  %v1786_v4 = vsub.f32 0.0, %v1780_v23 }
 0x54a   : > { %2062 = vpow2.f32 %v1787_v58  ;;  %v1793_v6 = vmul.f32 1.442695, %v1784_v62 }
 0x54b   : > { %2064 = vpow2.f32 %v1789_v1  ;;  %v1795_v7 = vmul.f32 1.442695, %v1785_v3  ;;  %v1797_v54 = vmul.f32 1.442695, %v1786_v4 }
 0x54c   : > { %2066 = vpow2.f32 %v1791_v2 }
 0x54d   : > { %2068 = vpow2.f32 %v1793_v6 }
 0x54e   : > { %2070 = vpow2.f32 %v1795_v7 }
 0x54f   : > { %2072 = vpow2.f32 %v1797_v54 }
 0x554   : > { %v2063_v63 = vpop.eup %2062 }
 0x555   : > { %v2065_v8 = vpop.eup %2064  ;;  %v1799_v60 = vadd.f32 1.0, %v2063_v63 }
 0x556   : > { %v2067_v9 = vpop.eup %2066  ;;  %v1800_v10 = vadd.f32 1.0, %v2065_v8 }
 0x557   : > { %v2069_v11 = vpop.eup %2068  ;;  %2074 = vrcp.f32 %v1799_v60  ;;  %v1801_v14 = vadd.f32 1.0, %v2067_v9 }
 0x558   : > { %v2071_v15 = vpop.eup %2070  ;;  %2076 = vrcp.f32 %v1800_v10  ;;  %v1802_v19 = vadd.f32 1.0, %v2069_v11 }
 0x559   : > { %v2073_v20 = vpop.eup %2072  ;;  %2078 = vrcp.f32 %v1801_v14  ;;  %v1803_v24 = vadd.f32 1.0, %v2071_v15 }
 0x55a   : > { %2080 = vrcp.f32 %v1802_v19  ;;  %v1804_v26 = vadd.f32 1.0, %v2073_v20 }
 0x55b   : > { %2082 = vrcp.f32 %v1803_v24 }
 0x55c   : > { %2084 = vrcp.f32 %v1804_v26 }
 0x561   : > { %v2075_v27 = vpop.eup %2074 }
 0x562   : > { %v2077_v28 = vpop.eup %2076  ;;  %v1811_v29 = vmul.f32 %v2075_v27, %v1775_v16 }
 0x563   : > { %v2079_v30 = vpop.eup %2078  ;;  %v1812_v32 = vmul.f32 %v2077_v28, %v1776_v51 }
 0x564   : > { %v2081_v35 = vpop.eup %2080  ;;  %1817 = vst [vmem:[%s467_s20] sm:$0xff] %v1811_v29  ;;  %v1813_v36 = vmul.f32 %v2079_v30, %v1777_v52 }
 0x565   : > { %v2083_v37 = vpop.eup %2082  ;;  %1818 = vst [vmem:[%s467_s20 + $0x8] sm:$0xff] %v1812_v32  ;;  %v1814_v38 = vmul.f32 %v2081_v35, %v1778_v59 }
 0x566   : > { %v2085_v39 = vpop.eup %2084  ;;  %1819 = vst [vmem:[%s467_s20 + $0x10] sm:$0xff] %v1813_v36  ;;  %v1815_v40 = vmul.f32 %v2083_v37, %v1779_v61 }
 0x567   : > { %1820 = vst [vmem:[%s467_s20 + $0x18] sm:$0xff] %v1814_v38  ;;  %v1816_v41 = vmul.f32 %v2085_v39, %v1780_v23 }
 0x568   : > { %1821 = vst [vmem:[%s467_s20 + $0x20] sm:$0xff] %v1815_v40 }
 0x569   : > { %1822 = vst [vmem:[%s467_s20 + $0x28] sm:$0xff] %v1816_v41 }
 0x56a PF: > { %s24_s29 = sadd.s32 1, %s2092_s29  }
 0x56b   : > { %p21_p4 = scmp.ge.s32.totalorder %s24_s29, 4  }
 0x56d   :  { %23 = sbr.rel (!%p21_p4) target bundleno = 1 (0x1), region = 106 }

</bundles_post_ra>
